<compile_context>
chip_gen: v7x
topology: tpu7x:2x2x1
jax: 0.10.0
libtpu: 0.0.40
codegen_flags: <defaults>
</compile_context>

<pallas_src>
import jax
import jax.numpy as jnp
from jax.experimental import pallas as pl
from jax.experimental.pallas import tpu as pltpu


def mlp_kernel(x_ref, w1_ref, b1_ref, w2_ref, b2_ref, w3_ref, b3_ref, o_ref, h_ref):
    # Layer 1: (TB, 896) @ (896, 512) -> (TB, 512), f32 accumulate, +bias, ReLU.
    h_ref[...] = jnp.maximum(
        jnp.dot(x_ref[...], w1_ref[...], preferred_element_type=jnp.float32)
        + b1_ref[...],
        0.0,
    )
    # Layer 2: (TB, 512) @ (512, 512).
    h2 = jnp.maximum(
        jnp.dot(h_ref[...].astype(jnp.bfloat16), w2_ref[...],
                preferred_element_type=jnp.float32)
        + b2_ref[...],
        0.0,
    )
    # Layer 3: (TB, 512) @ (512, 128) -> lane-dense padded logits.
    o_ref[...] = (
        jnp.dot(h2.astype(jnp.bfloat16), w3_ref[...],
                preferred_element_type=jnp.float32)
        + b3_ref[...]
    )


def neural_network_forward(x, params, *, tb_max=256):
    """x: (B, 28, 28) float32 -> logits (B, 10) float32."""
    w1, b1, w2, b2, w3, b3 = params
    B = x.shape[0]
    K, K_PAD = 28 * 28, 896          # 896 = 7 * 128 (lane-aligned contraction)
    H = 512
    N_OUT, N_PAD = 10, 128           # lane-dense output block

    # Flatten + pad K dim to a multiple of 128.
    x_flat = x.reshape(B, K)
    x_flat = jnp.pad(x_flat, ((0, 0), (0, K_PAD - K)))

    # Choose a batch tile (multiple of 8) and pad B so every grid block is full.
    b_pad8 = ((B + 7) // 8) * 8
    TB = min(tb_max, b_pad8)
    B_pad = ((B + TB - 1) // TB) * TB
    x_flat = jnp.pad(x_flat, ((0, B_pad - B), (0, 0))).astype(jnp.bfloat16)

    # bf16 weights (halve HBM traffic); biases stay f32 and are added post-dot.
    w1p = jnp.pad(w1, ((0, K_PAD - K), (0, 0))).astype(jnp.bfloat16)
    w2p = w2.astype(jnp.bfloat16)
    w3p = jnp.pad(w3, ((0, 0), (0, N_PAD - N_OUT))).astype(jnp.bfloat16)
    b3p = jnp.pad(b3, ((0, 0), (0, N_PAD - N_OUT)))

    grid = (B_pad // TB,)

    def resident(shape):
        # Constant block index -> the weight/bias tile stays in VMEM across steps.
        return pl.BlockSpec(shape, lambda i: (0, 0))

    flops = 2 * B_pad * (K_PAD * H + H * H + H * N_PAD)
    bytes_accessed = (
        x_flat.size * 2 + w1p.size * 2 + w2p.size * 2 + w3p.size * 2
        + b1.size * 4 + b2.size * 4 + b3p.size * 4 + B_pad * N_PAD * 4
    )

    out = pl.pallas_call(
        mlp_kernel,
        out_shape=jax.ShapeDtypeStruct((B_pad, N_PAD), jnp.float32),
        grid=grid,
        in_specs=[
            pl.BlockSpec((TB, K_PAD), lambda i: (i, 0)),   # streamed input tile
            resident((K_PAD, H)),
            resident((1, H)),
            resident((H, H)),
            resident((1, H)),
            resident((H, N_PAD)),
            resident((1, N_PAD)),
        ],
        out_specs=pl.BlockSpec((TB, N_PAD), lambda i: (i, 0)),
        scratch_shapes=[pltpu.VMEM((TB, H), jnp.float32)],
        compiler_params=pltpu.CompilerParams(
            dimension_semantics=("parallel",),   # shard batch tiles across TCs (v7x)
            vmem_limit_bytes=16 << 20,
        ),
        cost_estimate=pl.CostEstimate(
            flops=flops, transcendentals=0, bytes_accessed=bytes_accessed
        ),
    )(x_flat, w1p, b1, w2p, b2, w3p, b3p)

    return out[:B, :N_OUT]


def init_params(key):
    """Deterministic init matching nn.Linear shapes, stored as (in, out)."""
    k1, k2, k3, k4, k5, k6 = jax.random.split(key, 6)

    def linear_init(kw, kb, fan_in, fan_out):
        bound = 1.0 / jnp.sqrt(fan_in)
        w = jax.random.uniform(kw, (fan_in, fan_out), jnp.float32, -bound, bound)
        b = jax.random.uniform(kb, (1, fan_out), jnp.float32, -bound, bound)
        return w, b

    w1, b1 = linear_init(k1, k2, 28 * 28, 512)
    w2, b2 = linear_init(k3, k4, 512, 512)
    w3, b3 = linear_init(k5, k6, 512, 10)
    return (w1, b1, w2, b2, w3, b3)


if __name__ == "__main__":
    key = jax.random.PRNGKey(0)
    kx, kp = jax.random.split(key)

    B = 2
    x = jax.random.uniform(kx, (B, 28, 28), jnp.float32)
    params = init_params(kp)

    logits = neural_network_forward(x, params)
    logits = jax.block_until_ready(logits)

    # Reference (plain JAX) mirroring the kernel's bf16-in / f32-accumulate math.
    w1, b1, w2, b2, w3, b3 = params
    xf = x.reshape(B, -1).astype(jnp.bfloat16)
    w1b, w2b, w3b = (w.astype(jnp.bfloat16) for w in (w1, w2, w3))
    h1 = jnp.maximum(jnp.dot(xf, w1b, preferred_element_type=jnp.float32) + b1, 0.0)
    h2 = jnp.maximum(
        jnp.dot(h1.astype(jnp.bfloat16), w2b, preferred_element_type=jnp.float32) + b2,
        0.0,
    )
    ref = jnp.dot(h2.astype(jnp.bfloat16), w3b, preferred_element_type=jnp.float32) + b3

    assert logits.shape == (B, 10)
    assert jnp.allclose(logits, ref, atol=2e-2, rtol=2e-2)

    print("KERNEL_OK")
</pallas_src>

<mosaic_0001>
module attributes {stable_mosaic.version = 11 : i64} {
  func.func @mlp_kernel(%arg0: i32, %arg1: memref<8x896xbf16, #tpu.memory_space<vmem>>, %arg2: memref<896x512xbf16, #tpu.memory_space<vmem>>, %arg3: memref<1x512xf32, #tpu.memory_space<vmem>>, %arg4: memref<512x512xbf16, #tpu.memory_space<vmem>>, %arg5: memref<1x512xf32, #tpu.memory_space<vmem>>, %arg6: memref<512x128xbf16, #tpu.memory_space<vmem>>, %arg7: memref<1x128xf32, #tpu.memory_space<vmem>>, %arg8: memref<8x128xf32, #tpu.memory_space<vmem>>, %arg9: memref<8x512xf32, #tpu.memory_space<vmem>>) attributes {dimension_semantics = [#tpu.dimension_semantics<parallel>], iteration_bounds = array<i64: 1>, scalar_prefetch = 0 : i64, scratch_operands = 1 : i64, tpu.core_type = #tpu.core_type<tc>, window_params = [{transform_indices = @transform_0, window_bounds = array<i64: 8, 896>}, {pipeline_mode = #tpu.pipeline_mode<synchronous>, transform_indices = @transform_1, window_bounds = array<i64: 896, 512>}, {pipeline_mode = #tpu.pipeline_mode<synchronous>, transform_indices = @transform_2, window_bounds = array<i64: 1, 512>}, {pipeline_mode = #tpu.pipeline_mode<synchronous>, transform_indices = @transform_3, window_bounds = array<i64: 512, 512>}, {pipeline_mode = #tpu.pipeline_mode<synchronous>, transform_indices = @transform_4, window_bounds = array<i64: 1, 512>}, {pipeline_mode = #tpu.pipeline_mode<synchronous>, transform_indices = @transform_5, window_bounds = array<i64: 512, 128>}, {pipeline_mode = #tpu.pipeline_mode<synchronous>, transform_indices = @transform_6, window_bounds = array<i64: 1, 128>}, {transform_indices = @transform_7, window_bounds = array<i64: 8, 128>}]} {
    %c0 = arith.constant 0 : index
    %c0_0 = arith.constant 0 : index
    %0 = vector.load %arg1[%c0, %c0_0] : memref<8x896xbf16, #tpu.memory_space<vmem>>, vector<8x896xbf16>
    %c0_1 = arith.constant 0 : index
    %c0_2 = arith.constant 0 : index
    %1 = vector.load %arg2[%c0_1, %c0_2] : memref<896x512xbf16, #tpu.memory_space<vmem>>, vector<896x512xbf16>
    %cst = arith.constant dense<0.000000e+00> : vector<8x512xf32>
    %2 = tpu.matmul %0, %1, %cst {dimension_numbers = #tpu.dot_dimension_numbers<[1], [0], [0], [1], [0, 0, 1, 1], [], []>} : vector<8x896xbf16>, vector<896x512xbf16>, vector<8x512xf32> -> vector<8x512xf32>
    %c0_3 = arith.constant 0 : index
    %c0_4 = arith.constant 0 : index
    %3 = vector.load %arg3[%c0_3, %c0_4] : memref<1x512xf32, #tpu.memory_space<vmem>>, vector<1x512xf32>
    %4 = vector.broadcast %3 : vector<1x512xf32> to vector<8x512xf32>
    %5 = arith.addf %2, %4 : vector<8x512xf32>
    %cst_5 = arith.constant 0.000000e+00 : f32
    %6 = vector.broadcast %cst_5 : f32 to vector<8x512xf32>
    %7 = arith.maximumf %5, %6 : vector<8x512xf32>
    %c0_6 = arith.constant 0 : index
    %c0_7 = arith.constant 0 : index
    %8 = vector.load %arg9[%c0_6, %c0_7] : memref<8x512xf32, #tpu.memory_space<vmem>>, vector<8x512xf32>
    tpu.vector_store %arg9[%c0_6, %c0_7], %7 {strides = array<i32>} : memref<8x512xf32, #tpu.memory_space<vmem>>, vector<8x512xf32>,
    %c0_8 = arith.constant 0 : index
    %c0_9 = arith.constant 0 : index
    %9 = vector.load %arg9[%c0_8, %c0_9] : memref<8x512xf32, #tpu.memory_space<vmem>>, vector<8x512xf32>
    %10 = arith.truncf %9 : vector<8x512xf32> to vector<8x512xbf16>
    %c0_10 = arith.constant 0 : index
    %c0_11 = arith.constant 0 : index
    %11 = vector.load %arg4[%c0_10, %c0_11] : memref<512x512xbf16, #tpu.memory_space<vmem>>, vector<512x512xbf16>
    %cst_12 = arith.constant dense<0.000000e+00> : vector<8x512xf32>
    %12 = tpu.matmul %10, %11, %cst_12 {dimension_numbers = #tpu.dot_dimension_numbers<[1], [0], [0], [1], [0, 0, 1, 1], [], []>} : vector<8x512xbf16>, vector<512x512xbf16>, vector<8x512xf32> -> vector<8x512xf32>
    %c0_13 = arith.constant 0 : index
    %c0_14 = arith.constant 0 : index
    %13 = vector.load %arg5[%c0_13, %c0_14] : memref<1x512xf32, #tpu.memory_space<vmem>>, vector<1x512xf32>
    %14 = vector.broadcast %13 : vector<1x512xf32> to vector<8x512xf32>
    %15 = arith.addf %12, %14 : vector<8x512xf32>
    %cst_15 = arith.constant 0.000000e+00 : f32
    %16 = vector.broadcast %cst_15 : f32 to vector<8x512xf32>
    %17 = arith.maximumf %15, %16 : vector<8x512xf32>
    %18 = arith.truncf %17 : vector<8x512xf32> to vector<8x512xbf16>
    %c0_16 = arith.constant 0 : index
    %c0_17 = arith.constant 0 : index
    %19 = vector.load %arg6[%c0_16, %c0_17] : memref<512x128xbf16, #tpu.memory_space<vmem>>, vector<512x128xbf16>
    %cst_18 = arith.constant dense<0.000000e+00> : vector<8x128xf32>
    %20 = tpu.matmul %18, %19, %cst_18 {dimension_numbers = #tpu.dot_dimension_numbers<[1], [0], [0], [1], [0, 0, 1, 1], [], []>} : vector<8x512xbf16>, vector<512x128xbf16>, vector<8x128xf32> -> vector<8x128xf32>
    %c0_19 = arith.constant 0 : index
    %c0_20 = arith.constant 0 : index
    %21 = vector.load %arg7[%c0_19, %c0_20] : memref<1x128xf32, #tpu.memory_space<vmem>>, vector<1x128xf32>
    %22 = vector.broadcast %21 : vector<1x128xf32> to vector<8x128xf32>
    %23 = arith.addf %20, %22 : vector<8x128xf32>
    %c0_21 = arith.constant 0 : index
    %c0_22 = arith.constant 0 : index
    %24 = vector.load %arg8[%c0_21, %c0_22] : memref<8x128xf32, #tpu.memory_space<vmem>>, vector<8x128xf32>
    tpu.vector_store %arg8[%c0_21, %c0_22], %23 {strides = array<i32>} : memref<8x128xf32, #tpu.memory_space<vmem>>, vector<8x128xf32>,
    return
  }
  func.func @transform_0(%arg0: i32) -> (i32, i32) {
    %c0_i32 = arith.constant 0 : i32
    %c0_i32_0 = arith.constant 0 : i32
    return %arg0, %c0_i32 : i32, i32
  }
  func.func @transform_1(%arg0: i32) -> (i32, i32) {
    %c0_i32 = arith.constant 0 : i32
    %c0_i32_0 = arith.constant 0 : i32
    %c0_i32_1 = arith.constant 0 : i32
    return %c0_i32, %c0_i32_0 : i32, i32
  }
  func.func @transform_2(%arg0: i32) -> (i32, i32) {
    %c0_i32 = arith.constant 0 : i32
    %c0_i32_0 = arith.constant 0 : i32
    %c0_i32_1 = arith.constant 0 : i32
    return %c0_i32, %c0_i32_0 : i32, i32
  }
  func.func @transform_3(%arg0: i32) -> (i32, i32) {
    %c0_i32 = arith.constant 0 : i32
    %c0_i32_0 = arith.constant 0 : i32
    %c0_i32_1 = arith.constant 0 : i32
    return %c0_i32, %c0_i32_0 : i32, i32
  }
  func.func @transform_4(%arg0: i32) -> (i32, i32) {
    %c0_i32 = arith.constant 0 : i32
    %c0_i32_0 = arith.constant 0 : i32
    %c0_i32_1 = arith.constant 0 : i32
    return %c0_i32, %c0_i32_0 : i32, i32
  }
  func.func @transform_5(%arg0: i32) -> (i32, i32) {
    %c0_i32 = arith.constant 0 : i32
    %c0_i32_0 = arith.constant 0 : i32
    %c0_i32_1 = arith.constant 0 : i32
    return %c0_i32, %c0_i32_0 : i32, i32
  }
  func.func @transform_6(%arg0: i32) -> (i32, i32) {
    %c0_i32 = arith.constant 0 : i32
    %c0_i32_0 = arith.constant 0 : i32
    %c0_i32_1 = arith.constant 0 : i32
    return %c0_i32, %c0_i32_0 : i32, i32
  }
  func.func @transform_7(%arg0: i32) -> (i32, i32) {
    %c0_i32 = arith.constant 0 : i32
    %c0_i32_0 = arith.constant 0 : i32
    return %arg0, %c0_i32 : i32, i32
  }
}

</mosaic_0001>

<bundles_post_ra>
// kernel: tpu_custom_call.1
= control target key start
LH: loop header
LB: loop body
LE: loop exit
PB: predicated region body
PF: predicated region fallthrough
CT: control target
= control target key end

     0   :  { %12 = vsyncpa [#allocation4], 0  ;;  %s4482_s0 = inlined_call_operand.hbm [shape: bf16[8,896], index: 0, kind: input, shape index: {}]   ;;  %s4483_s1 = inlined_call_operand.hbm [shape: bf16[896,512], index: 1, kind: input, shape index: {}]   ;;  %s4484_s2 = inlined_call_operand.vmem [shape: f32[1,512], index: 2, kind: input, shape index: {}]   ;;  %s4485_s3 = inlined_call_operand.hbm [shape: bf16[512,512], index: 3, kind: input, shape index: {}]   ;;  %s4486_s4 = inlined_call_operand.vmem [shape: f32[1,512], index: 4, kind: input, shape index: {}]   ;;  %s4487_s5 = inlined_call_operand.hbm [shape: bf16[512,128], index: 5, kind: input, shape index: {}]   ;;  %s4488_s6 = inlined_call_operand.vmem [shape: f32[1,128], index: 6, kind: input, shape index: {}]   ;;  %s4489_s7 = inlined_call_operand.hbm [shape: f32[8,128], index: 7, kind: output, shape index: {}]  }
   0x1   :  { %13 = vsyncpa [#allocation7], 0 }
   0x2   :  { %14 = vsyncpa [#allocation10], 0 }
   0x3   :  { %15 = vsyncpa [#allocation5], 0  ;;  %s4314_s24 = smov [#allocation6]   ;;  %s4196_s28 = scalar_lea.hbm %s4483_s1, 28672 }
   0x4   :  { %s31_s25 = sshll.u32 %s4314_s24, 4  ;;  %p4197_p0 = scmp.ne.s32.totalorder %s4483_s1, %s4196_s28  ;;  %s32_s25 = int_to_ptr.vmem [resolvable:$true] %s31_s25 }
   0x5   :  { %p4200_p1 = scmp.lt.u32.totalorder %s4196_s28, %s4483_s1 }
   0x7   :  { %p4202_p2 = pnand %p4200_p1, %p4197_p0 }
   0x9   :  { %4205 = shalt.err (!%p4202_p2)
}
   0xa   :  { %s4206_s10 = scalar_lea.vmem %s32_s25, 28672  ;;  %p4211_p4 = scmp.lt.s32.totalorder %s32_s25, %s32_s25 }
   0xb   :  { %p4207_p3 = scmp.ne.s32.totalorder %s32_s25, %s4206_s10  ;;  %p4212_p5 = scmp.lt.s32.totalorder %s4206_s10, %s4206_s10 }
   0xd   :  { %p4213_p6 = por %p4212_p5, %p4211_p4 }
   0xf   :  { %p4214_p7 = pnand %p4213_p6, %p4207_p3 }
  0x11   :  { %4217 = shalt.err (!%p4214_p7)
}
  0x12   :  { %s4315_s11 = smov 256   ;;  %s4316_s12 = smov 16  }
  0x13   :  { %37 = dma.hbm_to_vmem [thread:$0]  %s4483_s1, 28672, %s32_s25, [#allocation7], %s4315_s11, %s4315_s11, %s4316_s12  }
  0x14   :  { %s4317_s15 = smov [#allocation3]   ;;  %s4318_s17 = smov [#allocation8]  }
  0x15   :  { %s22_s16 = sshll.u32 %s4317_s15, 4  ;;  %s45_s18 = sshll.u32 %s4318_s17, 4  ;;  %s23_s16 = int_to_ptr.vmem [resolvable:$true] %s22_s16  ;;  %s46_s18 = int_to_ptr.vmem [resolvable:$true] %s45_s18 }
  0x16   :  { %s4218_s21 = scalar_lea.hbm %s4482_s0, 448 }
  0x17   :  { %p4219_p8 = scmp.ne.s32.totalorder %s4482_s0, %s4218_s21  ;;  %p4222_p9 = scmp.lt.u32.totalorder %s4218_s21, %s4482_s0 }
  0x19   :  { %p4224_p10 = pnand %p4222_p9, %p4219_p8 }
  0x1b   :  { %4227 = shalt.err (!%p4224_p10)
}
  0x1c   :  { %s4228_s1 = scalar_lea.vmem %s23_s16, 448  ;;  %p4233_p12 = scmp.lt.s32.totalorder %s23_s16, %s23_s16 }
  0x1d   :  { %p4229_p11 = scmp.ne.s32.totalorder %s23_s16, %s4228_s1  ;;  %p4234_p13 = scmp.lt.s32.totalorder %s4228_s1, %s4228_s1 }
  0x1f   :  { %p4235_p0 = por %p4234_p13, %p4233_p12 }
  0x21   :  { %p4236_p1 = pnand %p4235_p0, %p4229_p11 }
  0x23   :  { %4239 = shalt.err (!%p4236_p1)
}
  0x24   :  { %25 = dma.hbm_to_vmem [thread:$0]  %s4482_s0, 448, %s23_s16, [#allocation4]  }
  0x25   :  { %s4240_s30 = scalar_lea.hbm %s4485_s3, 16384 }
  0x26   :  { %p4241_p2 = scmp.ne.s32.totalorder %s4485_s3, %s4240_s30  ;;  %p4244_p3 = scmp.lt.u32.totalorder %s4240_s30, %s4485_s3 }
  0x28   :  { %p4246_p4 = pnand %p4244_p3, %p4241_p2 }
  0x2a   :  { %4249 = shalt.err (!%p4246_p4)
}
  0x2b   :  { %s4250_s14 = scalar_lea.vmem %s46_s18, 16384  ;;  %p4255_p6 = scmp.lt.s32.totalorder %s46_s18, %s46_s18 }
  0x2c   :  { %p4251_p5 = scmp.ne.s32.totalorder %s46_s18, %s4250_s14  ;;  %p4256_p7 = scmp.lt.s32.totalorder %s4250_s14, %s4250_s14 }
  0x2e   :  { %p4257_p8 = por %p4256_p7, %p4255_p6 }
  0x30   :  { %p4258_p9 = pnand %p4257_p8, %p4251_p5 }
  0x32   :  { %4261 = shalt.err (!%p4258_p9)
}
  0x33   :  { %51 = dma.hbm_to_vmem [thread:$0]  %s4485_s3, 16384, %s46_s18, [#allocation7], %s4315_s11, %s4315_s11, %s4316_s12  }
  0x34   :  { %s4319_s16 = smov [#allocation9]   ;;  %s4262_s21 = scalar_lea.hbm %s4487_s5, 4096 }
  0x35   :  { %s59_s17 = sshll.u32 %s4319_s16, 4  ;;  %p4263_p10 = scmp.ne.s32.totalorder %s4487_s5, %s4262_s21  ;;  %s60_s17 = int_to_ptr.vmem [resolvable:$true] %s59_s17 }
  0x36   :  { %p4266_p11 = scmp.lt.u32.totalorder %s4262_s21, %s4487_s5 }
  0x38   :  { %p4268_p12 = pnand %p4266_p11, %p4263_p10 }
  0x3a   :  { %4271 = shalt.err (!%p4268_p12)
}
  0x3b   :  { %s4272_s1 = scalar_lea.vmem %s60_s17, 4096  ;;  %p4277_p0 = scmp.lt.s32.totalorder %s60_s17, %s60_s17 }
  0x3c   :  { %p4273_p13 = scmp.ne.s32.totalorder %s60_s17, %s4272_s1  ;;  %p4278_p1 = scmp.lt.s32.totalorder %s4272_s1, %s4272_s1 }
  0x3e   :  { %p4279_p2 = por %p4278_p1, %p4277_p0 }
  0x40   :  { %p4280_p3 = pnand %p4279_p2, %p4273_p13 }
  0x42   :  { %4283 = shalt.err (!%p4280_p3)
}
  0x43   :  { %s4320_s3 = smov 64   ;;  %s4321_s11 = smov 4  }
  0x44   :  { %65 = dma.hbm_to_vmem [thread:$0]  %s4487_s5, 4096, %s60_s17, [#allocation10], %s4320_s3, %s4320_s3, %s4321_s11  }
  0x45   :  { %4306 = dma.done.wait [#allocation4], 448  }
  0x46   :  { %4307 = vsyncadd [#allocation4], 4294966848 }
  0x47   :  { %4308 = dma.done.wait [#allocation7], 45056  }
  0x48   :  { %4309 = vsyncadd [#allocation7], 4294922240 }
  0x49   :  { %4310 = dma.done.wait [#allocation10], 4096  }
  0x4a   :  { %4311 = vsyncadd [#allocation10], 4294963200  ;;  %v3629_v0 = vld [vmem:[#allocation6 + $0x4] ss:$16 sps:$4 sm:$0xff]   ;;  %v3631_v1 = vld [vmem:[#allocation6 + $0xc] ss:$16 sps:$4 sm:$0xff]  }
  0x4b   :  { %1476 = vmatprep.subr.bf16.mxu0 %v3629_v0  ;;  %v3633_v2 = vld [vmem:[#allocation6] ss:$16 sps:$4 sm:$0xff]   ;;  %v3634_v3 = vld [vmem:[#allocation6 + $0x8] ss:$16 sps:$4 sm:$0xff]   ;;  %1640 = vmatprep.subr.bf16.mxu1 %v3631_v1  ;;  %v3635_v4 = vld [vmem:[#allocation6 + $0x24] ss:$16 sps:$4 sm:$0xff]  }
  0x4c   :  { %1477 = vmatpush1.bf16.msra.mxu0 %v3633_v2  ;;  %1641 = vmatpush1.bf16.msra.mxu1 %v3634_v3  ;;  %v3637_v5 = vld [vmem:[#allocation6 + $0x2c] ss:$16 sps:$4 sm:$0xff]   ;;  %v3639_v6 = vld [vmem:[#allocation6 + $0x20] ss:$16 sps:$4 sm:$0xff]   ;;  %v3640_v7 = vld [vmem:[#allocation6 + $0x28] ss:$16 sps:$4 sm:$0xff]  }
  0x4d   :  { %1478 = vmatprep.subr.bf16.mxu0 %v3635_v4  ;;  %1642 = vmatprep.subr.bf16.mxu1 %v3637_v5  ;;  %v3641_v8 = vld [vmem:[#allocation6 + $0x44] ss:$16 sps:$4 sm:$0xff]   ;;  %v3643_v9 = vld [vmem:[#allocation6 + $0x4c] ss:$16 sps:$4 sm:$0xff]   ;;  %v3645_v10 = vld [vmem:[#allocation6 + $0x40] ss:$16 sps:$4 sm:$0xff]  }
  0x4e   :  { %v3646_v11 = vld [vmem:[#allocation6 + $0x48] ss:$16 sps:$4 sm:$0xff]   ;;  %v3647_v12 = vld [vmem:[#allocation6 + $0x64] ss:$16 sps:$4 sm:$0xff]   ;;  %v3649_v13 = vld [vmem:[#allocation6 + $0x6c] ss:$16 sps:$4 sm:$0xff]  }
  0x4f   :  { %v3651_v14 = vld [vmem:[#allocation6 + $0x60] ss:$16 sps:$4 sm:$0xff]   ;;  %v3652_v15 = vld [vmem:[#allocation6 + $0x68] ss:$16 sps:$4 sm:$0xff]   ;;  %v3653_v16 = vld [vmem:[#allocation6 + $0x84] ss:$16 sps:$4 sm:$0xff]  }
  0x50   :  { %1479 = vmatpush1.bf16.msra.mxu0 %v3639_v6  ;;  %1643 = vmatpush1.bf16.msra.mxu1 %v3640_v7  ;;  %v3655_v17 = vld [vmem:[#allocation6 + $0x8c] ss:$16 sps:$4 sm:$0xff]   ;;  %v3657_v18 = vld [vmem:[#allocation6 + $0x80] ss:$16 sps:$4 sm:$0xff]   ;;  %v3658_v19 = vld [vmem:[#allocation6 + $0x88] ss:$16 sps:$4 sm:$0xff]  }
  0x51   :  { %1480 = vmatprep.subr.bf16.mxu0 %v3641_v8  ;;  %1644 = vmatprep.subr.bf16.mxu1 %v3643_v9  ;;  %v3659_v20 = vld [vmem:[#allocation6 + $0xa4] ss:$16 sps:$4 sm:$0xff]   ;;  %v3661_v21 = vld [vmem:[#allocation6 + $0xac] ss:$16 sps:$4 sm:$0xff]   ;;  %v3663_v22 = vld [vmem:[#allocation6 + $0xa0] ss:$16 sps:$4 sm:$0xff]  }
  0x52   :  { %v3664_v23 = vld [vmem:[#allocation6 + $0xa8] ss:$16 sps:$4 sm:$0xff]   ;;  %v3665_v24 = vld [vmem:[#allocation6 + $0xc4] ss:$16 sps:$4 sm:$0xff]   ;;  %v3667_v25 = vld [vmem:[#allocation6 + $0xcc] ss:$16 sps:$4 sm:$0xff]  }
  0x53   :  { %v3669_v26 = vld [vmem:[#allocation6 + $0xc0] ss:$16 sps:$4 sm:$0xff]   ;;  %v3670_v27 = vld [vmem:[#allocation6 + $0xc8] ss:$16 sps:$4 sm:$0xff]   ;;  %v3671_v28 = vld [vmem:[#allocation6 + $0xe4] ss:$16 sps:$4 sm:$0xff]  }
  0x54   :  { %1481 = vmatpush1.bf16.msra.mxu0 %v3645_v10  ;;  %1645 = vmatpush1.bf16.msra.mxu1 %v3646_v11  ;;  %v3673_v29 = vld [vmem:[#allocation6 + $0xec] ss:$16 sps:$4 sm:$0xff]   ;;  %v3675_v30 = vld [vmem:[#allocation6 + $0xe0] ss:$16 sps:$4 sm:$0xff]   ;;  %v3676_v31 = vld [vmem:[#allocation6 + $0xe8] ss:$16 sps:$4 sm:$0xff]  }
  0x55   :  { %1482 = vmatprep.subr.bf16.mxu0 %v3647_v12  ;;  %1646 = vmatprep.subr.bf16.mxu1 %v3649_v13  ;;  %v3677_v32 = vld [vmem:[#allocation6 + $0x104] ss:$16 sps:$4 sm:$0xff]   ;;  %v3679_v33 = vld [vmem:[#allocation6 + $0x10c] ss:$16 sps:$4 sm:$0xff]   ;;  %v3681_v34 = vld [vmem:[#allocation6 + $0x100] ss:$16 sps:$4 sm:$0xff]  }
  0x56   :  { %v3682_v35 = vld [vmem:[#allocation6 + $0x108] ss:$16 sps:$4 sm:$0xff]   ;;  %v3683_v36 = vld [vmem:[#allocation6 + $0x124] ss:$16 sps:$4 sm:$0xff]   ;;  %v3685_v37 = vld [vmem:[#allocation6 + $0x12c] ss:$16 sps:$4 sm:$0xff]  }
  0x57   :  { %v3687_v38 = vld [vmem:[#allocation6 + $0x120] ss:$16 sps:$4 sm:$0xff]   ;;  %v3688_v39 = vld [vmem:[#allocation6 + $0x128] ss:$16 sps:$4 sm:$0xff]   ;;  %v3689_v40 = vld [vmem:[#allocation6 + $0x144] ss:$16 sps:$4 sm:$0xff]  }
  0x58   :  { %1483 = vmatpush1.bf16.msra.mxu0 %v3651_v14  ;;  %1647 = vmatpush1.bf16.msra.mxu1 %v3652_v15  ;;  %v3691_v41 = vld [vmem:[#allocation6 + $0x14c] ss:$16 sps:$4 sm:$0xff]   ;;  %v3693_v42 = vld [vmem:[#allocation6 + $0x140] ss:$16 sps:$4 sm:$0xff]   ;;  %v3694_v43 = vld [vmem:[#allocation6 + $0x148] ss:$16 sps:$4 sm:$0xff]  }
  0x59   :  { %1484 = vmatprep.subr.bf16.mxu0 %v3653_v16  ;;  %1648 = vmatprep.subr.bf16.mxu1 %v3655_v17  ;;  %v3695_v44 = vld [vmem:[#allocation6 + $0x164] ss:$16 sps:$4 sm:$0xff]   ;;  %v3697_v45 = vld [vmem:[#allocation6 + $0x16c] ss:$16 sps:$4 sm:$0xff]   ;;  %v3699_v47 = vld [vmem:[#allocation6 + $0x160] ss:$16 sps:$4 sm:$0xff]  }
  0x5a   :  { %v81_v46 = vld [vmem:[#allocation3] sm:$0xff]  ;;  %v3703_v51 = vld [vmem:[#allocation6 + $0x18c] ss:$16 sps:$4 sm:$0xff]   ;;  %v3705_v52 = vld [vmem:[#allocation6 + $0x180] ss:$16 sps:$4 sm:$0xff]   ;;  %s4323_s29 = smov [#allocation11]  }
  0x5b   :  { %v3144_v48 = vcombine.high %v81_v46, %v81_v46  ;;  %v3700_v49 = vld [vmem:[#allocation6 + $0x168] ss:$16 sps:$4 sm:$0xff]   ;;  %v3701_v50 = vld [vmem:[#allocation6 + $0x184] ss:$16 sps:$4 sm:$0xff]   ;;  %v3709_v55 = vld [vmem:[#allocation6 + $0x1ac] ss:$16 sps:$4 sm:$0xff]   ;;  %v3143_v4 = vcombine.low %v81_v46, %v81_v46 }
  0x5c   :  { %1485 = vmatpush1.bf16.msra.mxu0 %v3657_v18  ;;  %1649 = vmatpush1.bf16.msra.mxu1 %v3658_v19  ;;  %v3706_v53 = vld [vmem:[#allocation6 + $0x188] ss:$16 sps:$4 sm:$0xff]   ;;  %v3707_v54 = vld [vmem:[#allocation6 + $0x1a4] ss:$16 sps:$4 sm:$0xff]   ;;  %v3711_v56 = vld [vmem:[#allocation6 + $0x1a0] ss:$16 sps:$4 sm:$0xff]  }
  0x5d   :  { %1486 = vmatprep.subr.bf16.mxu0 %v3659_v20  ;;  %1650 = vmatprep.subr.bf16.mxu1 %v3661_v21  ;;  %v3712_v57 = vld [vmem:[#allocation6 + $0x1a8] ss:$16 sps:$4 sm:$0xff]   ;;  %v3713_v58 = vld [vmem:[#allocation6 + $0x1c4] ss:$16 sps:$4 sm:$0xff]   ;;  %v3715_v59 = vld [vmem:[#allocation6 + $0x1cc] ss:$16 sps:$4 sm:$0xff]  }
  0x5e   :  { %1508 = vmatprep.mubr.bf16.mxu0 %v3144_v48  ;;  %1672 = vmatprep.mubr.bf16.mxu1 %v3144_v48  ;;  %v3717_v60 = vld [vmem:[#allocation6 + $0x1c0] ss:$16 sps:$4 sm:$0xff]   ;;  %v3718_v61 = vld [vmem:[#allocation6 + $0x1c8] ss:$16 sps:$4 sm:$0xff]   ;;  %v3719_v62 = vld [vmem:[#allocation6 + $0x1e4] ss:$16 sps:$4 sm:$0xff]  }
  0x5f   :  { %v3721_v63 = vld [vmem:[#allocation6 + $0x1ec] ss:$16 sps:$4 sm:$0xff]   ;;  %v3723_v0 = vld [vmem:[#allocation6 + $0x1e0] ss:$16 sps:$4 sm:$0xff]   ;;  %v3724_v1 = vld [vmem:[#allocation6 + $0x1e8] ss:$16 sps:$4 sm:$0xff]  }
  0x60   :  { %1487 = vmatpush1.bf16.msra.mxu0 %v3663_v22  ;;  %1651 = vmatpush1.bf16.msra.mxu1 %v3664_v23  ;;  %v3729_v2 = vld [vmem:[#allocation6 + $0x204] ss:$16 sps:$4 sm:$0xff]   ;;  %v3732_v3 = vld [vmem:[#allocation6 + $0x20c] ss:$16 sps:$4 sm:$0xff]   ;;  %v3727_v5 = vld [vmem:[#allocation6 + $0x200] ss:$16 sps:$4 sm:$0xff]  }
  0x61   :  { %1488 = vmatprep.subr.bf16.mxu0 %v3665_v24  ;;  %1652 = vmatprep.subr.bf16.mxu1 %v3667_v25  ;;  %v3730_v6 = vld [vmem:[#allocation6 + $0x208] ss:$16 sps:$4 sm:$0xff]   ;;  %v3735_v7 = vld [vmem:[#allocation6 + $0x224] ss:$16 sps:$4 sm:$0xff]   ;;  %v3738_v8 = vld [vmem:[#allocation6 + $0x22c] ss:$16 sps:$4 sm:$0xff]  }
  0x62   :  { %v3733_v9 = vld [vmem:[#allocation6 + $0x220] ss:$16 sps:$4 sm:$0xff]   ;;  %v3736_v10 = vld [vmem:[#allocation6 + $0x228] ss:$16 sps:$4 sm:$0xff]   ;;  %v3741_v11 = vld [vmem:[#allocation6 + $0x244] ss:$16 sps:$4 sm:$0xff]  }
  0x63   :  { %v3744_v12 = vld [vmem:[#allocation6 + $0x24c] ss:$16 sps:$4 sm:$0xff]   ;;  %v3739_v13 = vld [vmem:[#allocation6 + $0x240] ss:$16 sps:$4 sm:$0xff]   ;;  %v3742_v14 = vld [vmem:[#allocation6 + $0x248] ss:$16 sps:$4 sm:$0xff]  }
  0x64   :  { %1489 = vmatpush1.bf16.msra.mxu0 %v3669_v26  ;;  %1653 = vmatpush1.bf16.msra.mxu1 %v3670_v27  ;;  %v3747_v15 = vld [vmem:[#allocation6 + $0x264] ss:$16 sps:$4 sm:$0xff]   ;;  %v3750_v16 = vld [vmem:[#allocation6 + $0x26c] ss:$16 sps:$4 sm:$0xff]   ;;  %v3745_v17 = vld [vmem:[#allocation6 + $0x260] ss:$16 sps:$4 sm:$0xff]  }
  0x65   :  { %1490 = vmatprep.subr.bf16.mxu0 %v3671_v28  ;;  %1654 = vmatprep.subr.bf16.mxu1 %v3673_v29  ;;  %v3748_v18 = vld [vmem:[#allocation6 + $0x268] ss:$16 sps:$4 sm:$0xff]   ;;  %v3753_v19 = vld [vmem:[#allocation6 + $0x284] ss:$16 sps:$4 sm:$0xff]   ;;  %v3756_v20 = vld [vmem:[#allocation6 + $0x28c] ss:$16 sps:$4 sm:$0xff]  }
  0x66   :  { %v3751_v21 = vld [vmem:[#allocation6 + $0x280] ss:$16 sps:$4 sm:$0xff]   ;;  %v3754_v22 = vld [vmem:[#allocation6 + $0x288] ss:$16 sps:$4 sm:$0xff]   ;;  %v3759_v23 = vld [vmem:[#allocation6 + $0x2a4] ss:$16 sps:$4 sm:$0xff]  }
  0x67   :  { %v3762_v24 = vld [vmem:[#allocation6 + $0x2ac] ss:$16 sps:$4 sm:$0xff]   ;;  %v3757_v25 = vld [vmem:[#allocation6 + $0x2a0] ss:$16 sps:$4 sm:$0xff]   ;;  %v3760_v26 = vld [vmem:[#allocation6 + $0x2a8] ss:$16 sps:$4 sm:$0xff]  }
  0x68   :  { %1491 = vmatpush1.bf16.msra.mxu0 %v3675_v30  ;;  %1655 = vmatpush1.bf16.msra.mxu1 %v3676_v31  ;;  %v3765_v27 = vld [vmem:[#allocation6 + $0x2c4] ss:$16 sps:$4 sm:$0xff]   ;;  %v3768_v28 = vld [vmem:[#allocation6 + $0x2cc] ss:$16 sps:$4 sm:$0xff]   ;;  %v3763_v31 = vld [vmem:[#allocation6 + $0x2c0] ss:$16 sps:$4 sm:$0xff]  }
  0x69   :  { %1492 = vmatprep.subr.bf16.mxu0 %v3677_v32  ;;  %1656 = vmatprep.subr.bf16.mxu1 %v3679_v33  ;;  %v4418_v29 = vld [vmem:[#allocation3 + $0x8] sm:$0xff]  ;;  %v3766_v32 = vld [vmem:[#allocation6 + $0x2c8] ss:$16 sps:$4 sm:$0xff]   ;;  %v3771_v33 = vld [vmem:[#allocation6 + $0x2e4] ss:$16 sps:$4 sm:$0xff]   ;;  %s3132_s30 = sshll.u32 %s4323_s29, 4  ;;  %s3133_s30 = int_to_ptr.vmem [resolvable:$true] %s3132_s30 }
  0x6a   :  { %v3146_v30 = vcombine.high %v4418_v29, %v4418_v29  ;;  %v3792_v46 = vld [vmem:[#allocation6 + $0x34c] ss:$16 sps:$4 sm:$0xff]   ;;  %v3790_v48 = vld [vmem:[#allocation6 + $0x348] ss:$16 sps:$4 sm:$0xff]   ;;  %s4284_s8 = scalar_lea.vmem %s3133_s30, 128  ;;  %p4289_p5 = scmp.lt.s32.totalorder %s3133_s30, %s3133_s30 }
  0x6b   :  { %p4285_p4 = scmp.ne.s32.totalorder %s3133_s30, %s4284_s8  ;;  %p4290_p6 = scmp.lt.s32.totalorder %s4284_s8, %s4284_s8 }
  0x6c   :  { %1493 = vmatpush1.bf16.msra.mxu0 %v3681_v34  ;;  %1657 = vmatpush1.bf16.msra.mxu1 %v3682_v35  ;;  %v3774_v34 = vld [vmem:[#allocation6 + $0x2ec] ss:$16 sps:$4 sm:$0xff]   ;;  %v3769_v35 = vld [vmem:[#allocation6 + $0x2e0] ss:$16 sps:$4 sm:$0xff]  }
  0x6d   :  { %1494 = vmatprep.subr.bf16.mxu0 %v3683_v36  ;;  %1658 = vmatprep.subr.bf16.mxu1 %v3685_v37  ;;  %v3772_v36 = vld [vmem:[#allocation6 + $0x2e8] ss:$16 sps:$4 sm:$0xff]   ;;  %v3777_v37 = vld [vmem:[#allocation6 + $0x304] ss:$16 sps:$4 sm:$0xff]   ;;  %p4291_p7 = por %p4290_p6, %p4289_p5 }
  0x6f   :  { %p4292_p8 = pnand %p4291_p7, %p4285_p4 }
  0x70   :  { %1495 = vmatpush1.bf16.msra.mxu0 %v3687_v38  ;;  %1659 = vmatpush1.bf16.msra.mxu1 %v3688_v39  ;;  %v3780_v38 = vld [vmem:[#allocation6 + $0x30c] ss:$16 sps:$4 sm:$0xff]   ;;  %v3775_v39 = vld [vmem:[#allocation6 + $0x300] ss:$16 sps:$4 sm:$0xff]  }
  0x71   :  { %1496 = vmatprep.subr.bf16.mxu0 %v3689_v40  ;;  %1660 = vmatprep.subr.bf16.mxu1 %v3691_v41  ;;  %v3778_v40 = vld [vmem:[#allocation6 + $0x308] ss:$16 sps:$4 sm:$0xff]   ;;  %v3783_v41 = vld [vmem:[#allocation6 + $0x324] ss:$16 sps:$4 sm:$0xff]  }
  0x74   :  { %1497 = vmatpush1.bf16.msra.mxu0 %v3693_v42  ;;  %1661 = vmatpush1.bf16.msra.mxu1 %v3694_v43  ;;  %v3786_v42 = vld [vmem:[#allocation6 + $0x32c] ss:$16 sps:$4 sm:$0xff]   ;;  %v3781_v43 = vld [vmem:[#allocation6 + $0x320] ss:$16 sps:$4 sm:$0xff]  }
  0x75   :  { %1498 = vmatprep.subr.bf16.mxu0 %v3695_v44  ;;  %1662 = vmatprep.subr.bf16.mxu1 %v3697_v45  ;;  %v3784_v44 = vld [vmem:[#allocation6 + $0x328] ss:$16 sps:$4 sm:$0xff]   ;;  %v3789_v45 = vld [vmem:[#allocation6 + $0x344] ss:$16 sps:$4 sm:$0xff]  }
  0x78   :  { %1499 = vmatpush1.bf16.msra.mxu0 %v3699_v47  ;;  %1663 = vmatpush1.bf16.msra.mxu1 %v3700_v49  ;;  %v3787_v47 = vld [vmem:[#allocation6 + $0x340] ss:$16 sps:$4 sm:$0xff]   ;;  %v3795_v49 = vld [vmem:[#allocation6 + $0x364] ss:$16 sps:$4 sm:$0xff]  }
  0x79   :  { %1500 = vmatprep.subr.bf16.mxu0 %v3701_v50  ;;  %1664 = vmatprep.subr.bf16.mxu1 %v3703_v51  ;;  %v3798_v50 = vld [vmem:[#allocation6 + $0x36c] ss:$16 sps:$4 sm:$0xff]   ;;  %v3793_v51 = vld [vmem:[#allocation6 + $0x360] ss:$16 sps:$4 sm:$0xff]  }
  0x7c   :  { %1501 = vmatpush1.bf16.msra.mxu0 %v3705_v52  ;;  %1665 = vmatpush1.bf16.msra.mxu1 %v3706_v53  ;;  %v3796_v52 = vld [vmem:[#allocation6 + $0x368] ss:$16 sps:$4 sm:$0xff]   ;;  %v3801_v53 = vld [vmem:[#allocation6 + $0x384] ss:$16 sps:$4 sm:$0xff]  }
  0x7d   :  { %1502 = vmatprep.subr.bf16.mxu0 %v3707_v54  ;;  %1666 = vmatprep.subr.bf16.mxu1 %v3709_v55  ;;  %v3804_v54 = vld [vmem:[#allocation6 + $0x38c] ss:$16 sps:$4 sm:$0xff]   ;;  %v3799_v55 = vld [vmem:[#allocation6 + $0x380] ss:$16 sps:$4 sm:$0xff]  }
  0x80   :  { %1503 = vmatpush1.bf16.msra.mxu0 %v3711_v56  ;;  %1667 = vmatpush1.bf16.msra.mxu1 %v3712_v57  ;;  %v3802_v56 = vld [vmem:[#allocation6 + $0x388] ss:$16 sps:$4 sm:$0xff]   ;;  %v3807_v57 = vld [vmem:[#allocation6 + $0x3a4] ss:$16 sps:$4 sm:$0xff]  }
  0x81   :  { %1504 = vmatprep.subr.bf16.mxu0 %v3713_v58  ;;  %1668 = vmatprep.subr.bf16.mxu1 %v3715_v59  ;;  %v3810_v58 = vld [vmem:[#allocation6 + $0x3ac] ss:$16 sps:$4 sm:$0xff]   ;;  %v3805_v59 = vld [vmem:[#allocation6 + $0x3a0] ss:$16 sps:$4 sm:$0xff]  }
  0x84   :  { %1505 = vmatpush1.bf16.msra.mxu0 %v3717_v60  ;;  %1669 = vmatpush1.bf16.msra.mxu1 %v3718_v61  ;;  %v3808_v60 = vld [vmem:[#allocation6 + $0x3a8] ss:$16 sps:$4 sm:$0xff]   ;;  %v3813_v61 = vld [vmem:[#allocation6 + $0x3c4] ss:$16 sps:$4 sm:$0xff]  }
  0x85   :  { %1506 = vmatprep.subr.bf16.mxu0 %v3719_v62  ;;  %1670 = vmatprep.subr.bf16.mxu1 %v3721_v63  ;;  %v3816_v62 = vld [vmem:[#allocation6 + $0x3cc] ss:$16 sps:$4 sm:$0xff]   ;;  %v3811_v63 = vld [vmem:[#allocation6 + $0x3c0] ss:$16 sps:$4 sm:$0xff]  }
  0x88   :  { %1507 = vmatpush1.bf16.msra.mxu0 %v3723_v0  ;;  %1671 = vmatpush1.bf16.msra.mxu1 %v3724_v1  ;;  %v3814_v0 = vld [vmem:[#allocation6 + $0x3c8] ss:$16 sps:$4 sm:$0xff]   ;;  %v3819_v1 = vld [vmem:[#allocation6 + $0x3e4] ss:$16 sps:$4 sm:$0xff]  }
  0x89   :  { %1517 = vmatprep.subr.bf16.mxu0 %v3729_v2  ;;  %1681 = vmatprep.subr.bf16.mxu1 %v3732_v3  ;;  %v3822_v2 = vld [vmem:[#allocation6 + $0x3ec] ss:$16 sps:$4 sm:$0xff]   ;;  %v3817_v3 = vld [vmem:[#allocation6 + $0x3e0] ss:$16 sps:$4 sm:$0xff]  }
  0x8b   :  { %1509 = vmatmul.mubr.bf16.vlgmr.msra.gmra.mrb[0].mxu0 %v3143_v4  ;;  %1673 = vmatmul.mubr.bf16.vlgmr.msra.gmra.mrb[0].mxu1 %v3143_v4  ;;  %v3820_v4 = vld [vmem:[#allocation6 + $0x3e8] ss:$16 sps:$4 sm:$0xff]  }
  0x8c   :  { %1518 = vmatpush1.bf16.msra.mxu0 %v3727_v5  ;;  %1682 = vmatpush1.bf16.msra.mxu1 %v3730_v6  ;;  %v3827_v5 = vld [vmem:[#allocation6 + $0x404] ss:$16 sps:$4 sm:$0xff]   ;;  %v3830_v6 = vld [vmem:[#allocation6 + $0x40c] ss:$16 sps:$4 sm:$0xff]  }
  0x8d   :  { %1519 = vmatprep.subr.bf16.mxu0 %v3735_v7  ;;  %1683 = vmatprep.subr.bf16.mxu1 %v3738_v8  ;;  %v3145_v7 = vcombine.low %v4418_v29, %v4418_v29  ;;  %v3825_v8 = vld [vmem:[#allocation6 + $0x400] ss:$16 sps:$4 sm:$0xff]   ;;  %v3860_v29 = vld [vmem:[#allocation6 + $0x4ac] ss:$16 sps:$4 sm:$0xff]  }
  0x8e   :  { %1549 = vmatprep.mubr.bf16.mxu0 %v3146_v30  ;;  %1713 = vmatprep.mubr.bf16.mxu1 %v3146_v30  ;;  %v3855_v30 = vld [vmem:[#allocation6 + $0x4a0] ss:$16 sps:$4 sm:$0xff]  }
  0x90   :  { %1520 = vmatpush1.bf16.msra.mxu0 %v3733_v9  ;;  %1684 = vmatpush1.bf16.msra.mxu1 %v3736_v10  ;;  %v3828_v9 = vld [vmem:[#allocation6 + $0x408] ss:$16 sps:$4 sm:$0xff]   ;;  %v3833_v10 = vld [vmem:[#allocation6 + $0x424] ss:$16 sps:$4 sm:$0xff]  }
  0x91   :  { %1521 = vmatprep.subr.bf16.mxu0 %v3741_v11  ;;  %1685 = vmatprep.subr.bf16.mxu1 %v3744_v12  ;;  %v4424_v11 = vld [vmem:[#allocation3 + $0x10] sm:$0xff]  ;;  %v3836_v12 = vld [vmem:[#allocation6 + $0x42c] ss:$16 sps:$4 sm:$0xff]  }
  0x94   :  { %1522 = vmatpush1.bf16.msra.mxu0 %v3739_v13  ;;  %1686 = vmatpush1.bf16.msra.mxu1 %v3742_v14  ;;  %v3148_v13 = vcombine.high %v4424_v11, %v4424_v11  ;;  %v3831_v14 = vld [vmem:[#allocation6 + $0x420] ss:$16 sps:$4 sm:$0xff]  }
  0x95   :  { %1523 = vmatprep.subr.bf16.mxu0 %v3747_v15  ;;  %1687 = vmatprep.subr.bf16.mxu1 %v3750_v16  ;;  %v3834_v15 = vld [vmem:[#allocation6 + $0x428] ss:$16 sps:$4 sm:$0xff]   ;;  %v3839_v16 = vld [vmem:[#allocation6 + $0x444] ss:$16 sps:$4 sm:$0xff]  }
  0x98   :  { %1524 = vmatpush1.bf16.msra.mxu0 %v3745_v17  ;;  %1688 = vmatpush1.bf16.msra.mxu1 %v3748_v18  ;;  %v3842_v17 = vld [vmem:[#allocation6 + $0x44c] ss:$16 sps:$4 sm:$0xff]   ;;  %v3837_v18 = vld [vmem:[#allocation6 + $0x440] ss:$16 sps:$4 sm:$0xff]  }
  0x99   :  { %1525 = vmatprep.subr.bf16.mxu0 %v3753_v19  ;;  %1689 = vmatprep.subr.bf16.mxu1 %v3756_v20  ;;  %v3840_v19 = vld [vmem:[#allocation6 + $0x448] ss:$16 sps:$4 sm:$0xff]   ;;  %v3845_v20 = vld [vmem:[#allocation6 + $0x464] ss:$16 sps:$4 sm:$0xff]  }
  0x9c   :  { %1526 = vmatpush1.bf16.msra.mxu0 %v3751_v21  ;;  %1690 = vmatpush1.bf16.msra.mxu1 %v3754_v22  ;;  %v3848_v21 = vld [vmem:[#allocation6 + $0x46c] ss:$16 sps:$4 sm:$0xff]   ;;  %v3843_v22 = vld [vmem:[#allocation6 + $0x460] ss:$16 sps:$4 sm:$0xff]  }
  0x9d   :  { %1527 = vmatprep.subr.bf16.mxu0 %v3759_v23  ;;  %1691 = vmatprep.subr.bf16.mxu1 %v3762_v24  ;;  %v3846_v23 = vld [vmem:[#allocation6 + $0x468] ss:$16 sps:$4 sm:$0xff]   ;;  %v3851_v24 = vld [vmem:[#allocation6 + $0x484] ss:$16 sps:$4 sm:$0xff]  }
  0xa0   :  { %1528 = vmatpush1.bf16.msra.mxu0 %v3757_v25  ;;  %1692 = vmatpush1.bf16.msra.mxu1 %v3760_v26  ;;  %v3854_v25 = vld [vmem:[#allocation6 + $0x48c] ss:$16 sps:$4 sm:$0xff]   ;;  %v3849_v26 = vld [vmem:[#allocation6 + $0x480] ss:$16 sps:$4 sm:$0xff]  }
  0xa1   :  { %1529 = vmatprep.subr.bf16.mxu0 %v3765_v27  ;;  %1693 = vmatprep.subr.bf16.mxu1 %v3768_v28  ;;  %v3852_v27 = vld [vmem:[#allocation6 + $0x488] ss:$16 sps:$4 sm:$0xff]   ;;  %v3857_v28 = vld [vmem:[#allocation6 + $0x4a4] ss:$16 sps:$4 sm:$0xff]  }
  0xa4   :  { %1530 = vmatpush1.bf16.msra.mxu0 %v3763_v31  ;;  %1694 = vmatpush1.bf16.msra.mxu1 %v3766_v32  ;;  %v3858_v31 = vld [vmem:[#allocation6 + $0x4a8] ss:$16 sps:$4 sm:$0xff]   ;;  %v3863_v32 = vld [vmem:[#allocation6 + $0x4c4] ss:$16 sps:$4 sm:$0xff]  }
  0xa5   :  { %1531 = vmatprep.subr.bf16.mxu0 %v3771_v33  ;;  %1695 = vmatprep.subr.bf16.mxu1 %v3774_v34  ;;  %v3866_v33 = vld [vmem:[#allocation6 + $0x4cc] ss:$16 sps:$4 sm:$0xff]   ;;  %v3861_v34 = vld [vmem:[#allocation6 + $0x4c0] ss:$16 sps:$4 sm:$0xff]  }
  0xa8   :  { %1532 = vmatpush1.bf16.msra.mxu0 %v3769_v35  ;;  %1696 = vmatpush1.bf16.msra.mxu1 %v3772_v36  ;;  %v3864_v35 = vld [vmem:[#allocation6 + $0x4c8] ss:$16 sps:$4 sm:$0xff]   ;;  %v3869_v36 = vld [vmem:[#allocation6 + $0x4e4] ss:$16 sps:$4 sm:$0xff]  }
  0xa9   :  { %1533 = vmatprep.subr.bf16.mxu0 %v3777_v37  ;;  %1697 = vmatprep.subr.bf16.mxu1 %v3780_v38  ;;  %v3872_v37 = vld [vmem:[#allocation6 + $0x4ec] ss:$16 sps:$4 sm:$0xff]   ;;  %v3867_v38 = vld [vmem:[#allocation6 + $0x4e0] ss:$16 sps:$4 sm:$0xff]  }
  0xac   :  { %1534 = vmatpush1.bf16.msra.mxu0 %v3775_v39  ;;  %1698 = vmatpush1.bf16.msra.mxu1 %v3778_v40  ;;  %v3870_v39 = vld [vmem:[#allocation6 + $0x4e8] ss:$16 sps:$4 sm:$0xff]   ;;  %v3875_v40 = vld [vmem:[#allocation6 + $0x504] ss:$16 sps:$4 sm:$0xff]  }
  0xad   :  { %1535 = vmatprep.subr.bf16.mxu0 %v3783_v41  ;;  %1699 = vmatprep.subr.bf16.mxu1 %v3786_v42  ;;  %v3878_v41 = vld [vmem:[#allocation6 + $0x50c] ss:$16 sps:$4 sm:$0xff]   ;;  %v3873_v42 = vld [vmem:[#allocation6 + $0x500] ss:$16 sps:$4 sm:$0xff]  }
  0xb0   :  { %1536 = vmatpush1.bf16.msra.mxu0 %v3781_v43  ;;  %1700 = vmatpush1.bf16.msra.mxu1 %v3784_v44  ;;  %v3876_v43 = vld [vmem:[#allocation6 + $0x508] ss:$16 sps:$4 sm:$0xff]   ;;  %v3881_v44 = vld [vmem:[#allocation6 + $0x524] ss:$16 sps:$4 sm:$0xff]  }
  0xb1   :  { %1537 = vmatprep.subr.bf16.mxu0 %v3789_v45  ;;  %1701 = vmatprep.subr.bf16.mxu1 %v3792_v46  ;;  %v3884_v45 = vld [vmem:[#allocation6 + $0x52c] ss:$16 sps:$4 sm:$0xff]   ;;  %v3879_v46 = vld [vmem:[#allocation6 + $0x520] ss:$16 sps:$4 sm:$0xff]  }
  0xb4   :  { %1538 = vmatpush1.bf16.msra.mxu0 %v3787_v47  ;;  %1702 = vmatpush1.bf16.msra.mxu1 %v3790_v48  ;;  %v3882_v47 = vld [vmem:[#allocation6 + $0x528] ss:$16 sps:$4 sm:$0xff]   ;;  %v3887_v48 = vld [vmem:[#allocation6 + $0x544] ss:$16 sps:$4 sm:$0xff]  }
  0xb5   :  { %1539 = vmatprep.subr.bf16.mxu0 %v3795_v49  ;;  %1703 = vmatprep.subr.bf16.mxu1 %v3798_v50  ;;  %v3890_v49 = vld [vmem:[#allocation6 + $0x54c] ss:$16 sps:$4 sm:$0xff]   ;;  %v3885_v50 = vld [vmem:[#allocation6 + $0x540] ss:$16 sps:$4 sm:$0xff]  }
  0xb8   :  { %1540 = vmatpush1.bf16.msra.mxu0 %v3793_v51  ;;  %1704 = vmatpush1.bf16.msra.mxu1 %v3796_v52  ;;  %v3888_v51 = vld [vmem:[#allocation6 + $0x548] ss:$16 sps:$4 sm:$0xff]   ;;  %v3893_v52 = vld [vmem:[#allocation6 + $0x564] ss:$16 sps:$4 sm:$0xff]  }
  0xb9   :  { %1541 = vmatprep.subr.bf16.mxu0 %v3801_v53  ;;  %1705 = vmatprep.subr.bf16.mxu1 %v3804_v54  ;;  %v3896_v53 = vld [vmem:[#allocation6 + $0x56c] ss:$16 sps:$4 sm:$0xff]   ;;  %v3891_v54 = vld [vmem:[#allocation6 + $0x560] ss:$16 sps:$4 sm:$0xff]  }
  0xbc   :  { %1542 = vmatpush1.bf16.msra.mxu0 %v3799_v55  ;;  %1706 = vmatpush1.bf16.msra.mxu1 %v3802_v56  ;;  %v3894_v55 = vld [vmem:[#allocation6 + $0x568] ss:$16 sps:$4 sm:$0xff]   ;;  %v3899_v56 = vld [vmem:[#allocation6 + $0x584] ss:$16 sps:$4 sm:$0xff]  }
  0xbd   :  { %1543 = vmatprep.subr.bf16.mxu0 %v3807_v57  ;;  %1707 = vmatprep.subr.bf16.mxu1 %v3810_v58  ;;  %v3902_v57 = vld [vmem:[#allocation6 + $0x58c] ss:$16 sps:$4 sm:$0xff]   ;;  %v3897_v58 = vld [vmem:[#allocation6 + $0x580] ss:$16 sps:$4 sm:$0xff]  }
  0xc0   :  { %1544 = vmatpush1.bf16.msra.mxu0 %v3805_v59  ;;  %1708 = vmatpush1.bf16.msra.mxu1 %v3808_v60  ;;  %v3900_v59 = vld [vmem:[#allocation6 + $0x588] ss:$16 sps:$4 sm:$0xff]   ;;  %v3905_v60 = vld [vmem:[#allocation6 + $0x5a4] ss:$16 sps:$4 sm:$0xff]  }
  0xc1   :  { %1545 = vmatprep.subr.bf16.mxu0 %v3813_v61  ;;  %1709 = vmatprep.subr.bf16.mxu1 %v3816_v62  ;;  %v3908_v61 = vld [vmem:[#allocation6 + $0x5ac] ss:$16 sps:$4 sm:$0xff]   ;;  %v3903_v62 = vld [vmem:[#allocation6 + $0x5a0] ss:$16 sps:$4 sm:$0xff]  }
  0xc4   :  { %1546 = vmatpush1.bf16.msra.mxu0 %v3811_v63  ;;  %1710 = vmatpush1.bf16.msra.mxu1 %v3814_v0  ;;  %v3906_v63 = vld [vmem:[#allocation6 + $0x5a8] ss:$16 sps:$4 sm:$0xff]   ;;  %v3911_v0 = vld [vmem:[#allocation6 + $0x5c4] ss:$16 sps:$4 sm:$0xff]  }
  0xc5   :  { %1547 = vmatprep.subr.bf16.mxu0 %v3819_v1  ;;  %1711 = vmatprep.subr.bf16.mxu1 %v3822_v2  ;;  %v3914_v1 = vld [vmem:[#allocation6 + $0x5cc] ss:$16 sps:$4 sm:$0xff]   ;;  %v3909_v2 = vld [vmem:[#allocation6 + $0x5c0] ss:$16 sps:$4 sm:$0xff]  }
  0xc8   :  { %1548 = vmatpush1.bf16.msra.mxu0 %v3817_v3  ;;  %1712 = vmatpush1.bf16.msra.mxu1 %v3820_v4  ;;  %v3912_v3 = vld [vmem:[#allocation6 + $0x5c8] ss:$16 sps:$4 sm:$0xff]   ;;  %v3917_v4 = vld [vmem:[#allocation6 + $0x5e4] ss:$16 sps:$4 sm:$0xff]  }
  0xc9   :  { %1558 = vmatprep.subr.bf16.mxu0 %v3827_v5  ;;  %1722 = vmatprep.subr.bf16.mxu1 %v3830_v6  ;;  %v3920_v5 = vld [vmem:[#allocation6 + $0x5ec] ss:$16 sps:$4 sm:$0xff]   ;;  %v3915_v6 = vld [vmem:[#allocation6 + $0x5e0] ss:$16 sps:$4 sm:$0xff]  }
  0xcb   :  { %1550 = vmatmul.mubr.bf16.vlgmr.msra.gmra.mrb[0].mxu0 %v3145_v7  ;;  %1714 = vmatmul.mubr.bf16.vlgmr.msra.gmra.mrb[0].mxu1 %v3145_v7  ;;  %v3918_v7 = vld [vmem:[#allocation6 + $0x5e8] ss:$16 sps:$4 sm:$0xff]  }
  0xcc   :  { %1559 = vmatpush1.bf16.msra.mxu0 %v3825_v8  ;;  %1723 = vmatpush1.bf16.msra.mxu1 %v3828_v9  ;;  %v3925_v8 = vld [vmem:[#allocation6 + $0x604] ss:$16 sps:$4 sm:$0xff]   ;;  %v3928_v9 = vld [vmem:[#allocation6 + $0x60c] ss:$16 sps:$4 sm:$0xff]  }
  0xcd   :  { %1560 = vmatprep.subr.bf16.mxu0 %v3833_v10  ;;  %1724 = vmatprep.subr.bf16.mxu1 %v3836_v12  ;;  %v3923_v10 = vld [vmem:[#allocation6 + $0x600] ss:$16 sps:$4 sm:$0xff]   ;;  %v3926_v12 = vld [vmem:[#allocation6 + $0x608] ss:$16 sps:$4 sm:$0xff]  }
  0xce   :  { %1590 = vmatprep.mubr.bf16.mxu0 %v3148_v13  ;;  %1754 = vmatprep.mubr.bf16.mxu1 %v3148_v13  ;;  %v3147_v13 = vcombine.low %v4424_v11, %v4424_v11  ;;  %v3943_v11 = vld [vmem:[#allocation6 + $0x664] ss:$16 sps:$4 sm:$0xff]  }
  0xd0   :  { %1561 = vmatpush1.bf16.msra.mxu0 %v3831_v14  ;;  %1725 = vmatpush1.bf16.msra.mxu1 %v3834_v15  ;;  %v3931_v14 = vld [vmem:[#allocation6 + $0x624] ss:$16 sps:$4 sm:$0xff]   ;;  %v3934_v15 = vld [vmem:[#allocation6 + $0x62c] ss:$16 sps:$4 sm:$0xff]  }
  0xd1   :  { %1562 = vmatprep.subr.bf16.mxu0 %v3839_v16  ;;  %1726 = vmatprep.subr.bf16.mxu1 %v3842_v17  ;;  %v3929_v16 = vld [vmem:[#allocation6 + $0x620] ss:$16 sps:$4 sm:$0xff]   ;;  %v3932_v17 = vld [vmem:[#allocation6 + $0x628] ss:$16 sps:$4 sm:$0xff]  }
  0xd4   :  { %1563 = vmatpush1.bf16.msra.mxu0 %v3837_v18  ;;  %1727 = vmatpush1.bf16.msra.mxu1 %v3840_v19  ;;  %v3937_v18 = vld [vmem:[#allocation6 + $0x644] ss:$16 sps:$4 sm:$0xff]   ;;  %v3940_v19 = vld [vmem:[#allocation6 + $0x64c] ss:$16 sps:$4 sm:$0xff]  }
  0xd5   :  { %1564 = vmatprep.subr.bf16.mxu0 %v3845_v20  ;;  %1728 = vmatprep.subr.bf16.mxu1 %v3848_v21  ;;  %v3935_v20 = vld [vmem:[#allocation6 + $0x640] ss:$16 sps:$4 sm:$0xff]   ;;  %v3938_v21 = vld [vmem:[#allocation6 + $0x648] ss:$16 sps:$4 sm:$0xff]  }
  0xd8   :  { %1565 = vmatpush1.bf16.msra.mxu0 %v3843_v22  ;;  %1729 = vmatpush1.bf16.msra.mxu1 %v3846_v23  ;;  %v4322_v22 = vmov 0   ;;  %v3946_v23 = vld [vmem:[#allocation6 + $0x66c] ss:$16 sps:$4 sm:$0xff]  }
  0xd9   :  { %1566 = vmatprep.subr.bf16.mxu0 %v3851_v24  ;;  %1730 = vmatprep.subr.bf16.mxu1 %v3854_v25  ;;  %v3941_v24 = vld [vmem:[#allocation6 + $0x660] ss:$16 sps:$4 sm:$0xff]   ;;  %v3944_v25 = vld [vmem:[#allocation6 + $0x668] ss:$16 sps:$4 sm:$0xff]  }
  0xdc   :  { %1567 = vmatpush1.bf16.msra.mxu0 %v3849_v26  ;;  %1731 = vmatpush1.bf16.msra.mxu1 %v3852_v27  ;;  %v3949_v26 = vld [vmem:[#allocation6 + $0x684] ss:$16 sps:$4 sm:$0xff]   ;;  %v3952_v27 = vld [vmem:[#allocation6 + $0x68c] ss:$16 sps:$4 sm:$0xff]  }
  0xdd   :  { %1568 = vmatprep.subr.bf16.mxu0 %v3857_v28  ;;  %1732 = vmatprep.subr.bf16.mxu1 %v3860_v29  ;;  %v3947_v28 = vld [vmem:[#allocation6 + $0x680] ss:$16 sps:$4 sm:$0xff]   ;;  %v3950_v29 = vld [vmem:[#allocation6 + $0x688] ss:$16 sps:$4 sm:$0xff]  }
  0xe0   :  { %1569 = vmatpush1.bf16.msra.mxu0 %v3855_v30  ;;  %1733 = vmatpush1.bf16.msra.mxu1 %v3858_v31  ;;  %v3955_v30 = vld [vmem:[#allocation6 + $0x6a4] ss:$16 sps:$4 sm:$0xff]   ;;  %v3958_v31 = vld [vmem:[#allocation6 + $0x6ac] ss:$16 sps:$4 sm:$0xff]  }
  0xe1   :  { %1570 = vmatprep.subr.bf16.mxu0 %v3863_v32  ;;  %1734 = vmatprep.subr.bf16.mxu1 %v3866_v33  ;;  %v3953_v32 = vld [vmem:[#allocation6 + $0x6a0] ss:$16 sps:$4 sm:$0xff]   ;;  %v3956_v33 = vld [vmem:[#allocation6 + $0x6a8] ss:$16 sps:$4 sm:$0xff]  }
  0xe4   :  { %1571 = vmatpush1.bf16.msra.mxu0 %v3861_v34  ;;  %1735 = vmatpush1.bf16.msra.mxu1 %v3864_v35  ;;  %v3961_v34 = vld [vmem:[#allocation6 + $0x6c4] ss:$16 sps:$4 sm:$0xff]   ;;  %v3964_v35 = vld [vmem:[#allocation6 + $0x6cc] ss:$16 sps:$4 sm:$0xff]  }
  0xe5   :  { %1572 = vmatprep.subr.bf16.mxu0 %v3869_v36  ;;  %1736 = vmatprep.subr.bf16.mxu1 %v3872_v37  ;;  %v3959_v36 = vld [vmem:[#allocation6 + $0x6c0] ss:$16 sps:$4 sm:$0xff]   ;;  %v3962_v37 = vld [vmem:[#allocation6 + $0x6c8] ss:$16 sps:$4 sm:$0xff]  }
  0xe8   :  { %1573 = vmatpush1.bf16.msra.mxu0 %v3867_v38  ;;  %1737 = vmatpush1.bf16.msra.mxu1 %v3870_v39  ;;  %v3967_v38 = vld [vmem:[#allocation6 + $0x6e4] ss:$16 sps:$4 sm:$0xff]   ;;  %v3970_v39 = vld [vmem:[#allocation6 + $0x6ec] ss:$16 sps:$4 sm:$0xff]  }
  0xe9   :  { %1574 = vmatprep.subr.bf16.mxu0 %v3875_v40  ;;  %1738 = vmatprep.subr.bf16.mxu1 %v3878_v41  ;;  %v3965_v40 = vld [vmem:[#allocation6 + $0x6e0] ss:$16 sps:$4 sm:$0xff]   ;;  %v3968_v41 = vld [vmem:[#allocation6 + $0x6e8] ss:$16 sps:$4 sm:$0xff]  }
  0xec   :  { %1575 = vmatpush1.bf16.msra.mxu0 %v3873_v42  ;;  %1739 = vmatpush1.bf16.msra.mxu1 %v3876_v43  ;;  %v3974_v42 = vld [vmem:[#allocation8 + $0x4] ss:$16 sps:$4 sm:$0xff]   ;;  %v3977_v43 = vld [vmem:[#allocation8 + $0xc] ss:$16 sps:$4 sm:$0xff]  }
  0xed   :  { %1576 = vmatprep.subr.bf16.mxu0 %v3881_v44  ;;  %1740 = vmatprep.subr.bf16.mxu1 %v3884_v45  ;;  %v3971_v44 = vld [vmem:[#allocation3 + $0x18] ss:$0 sps:$4 sm:$0xff]   ;;  %v3972_v45 = vld [vmem:[#allocation8] ss:$16 sps:$4 sm:$0xff]  }
  0xf0   :  { %1577 = vmatpush1.bf16.msra.mxu0 %v3879_v46  ;;  %1741 = vmatpush1.bf16.msra.mxu1 %v3882_v47  ;;  %v3975_v46 = vld [vmem:[#allocation8 + $0x8] ss:$16 sps:$4 sm:$0xff]   ;;  %v3980_v47 = vld [vmem:[#allocation8 + $0x24] ss:$16 sps:$4 sm:$0xff]  }
  0xf1   :  { %1578 = vmatprep.subr.bf16.mxu0 %v3887_v48  ;;  %1742 = vmatprep.subr.bf16.mxu1 %v3890_v49  ;;  %v3983_v48 = vld [vmem:[#allocation8 + $0x2c] ss:$16 sps:$4 sm:$0xff]   ;;  %v3978_v49 = vld [vmem:[#allocation8 + $0x20] ss:$16 sps:$4 sm:$0xff]  }
  0xf4   :  { %1579 = vmatpush1.bf16.msra.mxu0 %v3885_v50  ;;  %1743 = vmatpush1.bf16.msra.mxu1 %v3888_v51  ;;  %v3981_v50 = vld [vmem:[#allocation8 + $0x28] ss:$16 sps:$4 sm:$0xff]   ;;  %v3986_v51 = vld [vmem:[#allocation8 + $0x44] ss:$16 sps:$4 sm:$0xff]  }
  0xf5   :  { %1580 = vmatprep.subr.bf16.mxu0 %v3893_v52  ;;  %1744 = vmatprep.subr.bf16.mxu1 %v3896_v53  ;;  %v3989_v52 = vld [vmem:[#allocation8 + $0x4c] ss:$16 sps:$4 sm:$0xff]   ;;  %v3984_v53 = vld [vmem:[#allocation8 + $0x40] ss:$16 sps:$4 sm:$0xff]  }
  0xf8   :  { %1581 = vmatpush1.bf16.msra.mxu0 %v3891_v54  ;;  %1745 = vmatpush1.bf16.msra.mxu1 %v3894_v55  ;;  %v3987_v54 = vld [vmem:[#allocation8 + $0x48] ss:$16 sps:$4 sm:$0xff]   ;;  %v3992_v55 = vld [vmem:[#allocation8 + $0x64] ss:$16 sps:$4 sm:$0xff]  }
  0xf9   :  { %1582 = vmatprep.subr.bf16.mxu0 %v3899_v56  ;;  %1746 = vmatprep.subr.bf16.mxu1 %v3902_v57  ;;  %v3995_v56 = vld [vmem:[#allocation8 + $0x6c] ss:$16 sps:$4 sm:$0xff]   ;;  %v3990_v57 = vld [vmem:[#allocation8 + $0x60] ss:$16 sps:$4 sm:$0xff]  }
  0xfc   :  { %1583 = vmatpush1.bf16.msra.mxu0 %v3897_v58  ;;  %1747 = vmatpush1.bf16.msra.mxu1 %v3900_v59  ;;  %v3993_v58 = vld [vmem:[#allocation8 + $0x68] ss:$16 sps:$4 sm:$0xff]   ;;  %v3998_v59 = vld [vmem:[#allocation8 + $0x84] ss:$16 sps:$4 sm:$0xff]  }
  0xfd   :  { %1584 = vmatprep.subr.bf16.mxu0 %v3905_v60  ;;  %1748 = vmatprep.subr.bf16.mxu1 %v3908_v61  ;;  %v4001_v60 = vld [vmem:[#allocation8 + $0x8c] ss:$16 sps:$4 sm:$0xff]   ;;  %v3996_v61 = vld [vmem:[#allocation8 + $0x80] ss:$16 sps:$4 sm:$0xff]  }
 0x100   :  { %1585 = vmatpush1.bf16.msra.mxu0 %v3903_v62  ;;  %1749 = vmatpush1.bf16.msra.mxu1 %v3906_v63  ;;  %v3999_v62 = vld [vmem:[#allocation8 + $0x88] ss:$16 sps:$4 sm:$0xff]   ;;  %v4004_v63 = vld [vmem:[#allocation8 + $0xa4] ss:$16 sps:$4 sm:$0xff]  }
 0x101   :  { %1586 = vmatprep.subr.bf16.mxu0 %v3911_v0  ;;  %1750 = vmatprep.subr.bf16.mxu1 %v3914_v1  ;;  %v4007_v0 = vld [vmem:[#allocation8 + $0xac] ss:$16 sps:$4 sm:$0xff]   ;;  %v4002_v1 = vld [vmem:[#allocation8 + $0xa0] ss:$16 sps:$4 sm:$0xff]  }
 0x104   :  { %1587 = vmatpush1.bf16.msra.mxu0 %v3909_v2  ;;  %1751 = vmatpush1.bf16.msra.mxu1 %v3912_v3  ;;  %v4005_v2 = vld [vmem:[#allocation8 + $0xa8] ss:$16 sps:$4 sm:$0xff]   ;;  %v4010_v3 = vld [vmem:[#allocation8 + $0xc4] ss:$16 sps:$4 sm:$0xff]  }
 0x105   :  { %1588 = vmatprep.subr.bf16.mxu0 %v3917_v4  ;;  %1752 = vmatprep.subr.bf16.mxu1 %v3920_v5  ;;  %v4013_v4 = vld [vmem:[#allocation8 + $0xcc] ss:$16 sps:$4 sm:$0xff]   ;;  %v4008_v5 = vld [vmem:[#allocation8 + $0xc0] ss:$16 sps:$4 sm:$0xff]  }
 0x108   :  { %1589 = vmatpush1.bf16.msra.mxu0 %v3915_v6  ;;  %1753 = vmatpush1.bf16.msra.mxu1 %v3918_v7  ;;  %v4011_v6 = vld [vmem:[#allocation8 + $0xc8] ss:$16 sps:$4 sm:$0xff]   ;;  %v4016_v7 = vld [vmem:[#allocation8 + $0xe4] ss:$16 sps:$4 sm:$0xff]  }
 0x109   :  { %1599 = vmatprep.subr.bf16.mxu0 %v3925_v8  ;;  %1763 = vmatprep.subr.bf16.mxu1 %v3928_v9  ;;  %v4019_v8 = vld [vmem:[#allocation8 + $0xec] ss:$16 sps:$4 sm:$0xff]   ;;  %v4014_v9 = vld [vmem:[#allocation8 + $0xe0] ss:$16 sps:$4 sm:$0xff]  }
 0x10b   :  { %1591 = vmatmul.mubr.bf16.vlgmr.msra.gmra.mrb[0].mxu0 %v3147_v13  ;;  %1755 = vmatmul.mubr.bf16.vlgmr.msra.gmra.mrb[0].mxu1 %v3147_v13  ;;  %v4025_v13 = vld [vmem:[#allocation8 + $0x10c] ss:$16 sps:$4 sm:$0xff]  }
 0x10c   :  { %1600 = vmatpush1.bf16.msra.mxu0 %v3923_v10  ;;  %1764 = vmatpush1.bf16.msra.mxu1 %v3926_v12  ;;  %v4017_v10 = vld [vmem:[#allocation8 + $0xe8] ss:$16 sps:$4 sm:$0xff]   ;;  %v4022_v12 = vld [vmem:[#allocation8 + $0x104] ss:$16 sps:$4 sm:$0xff]  }
 0x10d   :  { %1601 = vmatprep.subr.bf16.mxu0 %v3931_v14  ;;  %1765 = vmatprep.subr.bf16.mxu1 %v3934_v15  ;;  %v4020_v14 = vld [vmem:[#allocation8 + $0x100] ss:$16 sps:$4 sm:$0xff]   ;;  %v4023_v15 = vld [vmem:[#allocation8 + $0x108] ss:$16 sps:$4 sm:$0xff]  }
 0x10e   :  { %1631 = vmatprep.mubr.bf16.mxu0 %v4322_v22  ;;  %1795 = vmatprep.mubr.bf16.mxu1 %v4322_v22  ;;  %v4032_v22 = vld [vmem:[#allocation8 + $0x140] ss:$16 sps:$4 sm:$0xff]  }
 0x110   :  { %1602 = vmatpush1.bf16.msra.mxu0 %v3929_v16  ;;  %1766 = vmatpush1.bf16.msra.mxu1 %v3932_v17  ;;  %v4028_v16 = vld [vmem:[#allocation8 + $0x124] ss:$16 sps:$4 sm:$0xff]   ;;  %v4031_v17 = vld [vmem:[#allocation8 + $0x12c] ss:$16 sps:$4 sm:$0xff]  }
 0x111   :  { %1603 = vmatprep.subr.bf16.mxu0 %v3937_v18  ;;  %1767 = vmatprep.subr.bf16.mxu1 %v3940_v19  ;;  %v4026_v18 = vld [vmem:[#allocation8 + $0x120] ss:$16 sps:$4 sm:$0xff]   ;;  %v4029_v19 = vld [vmem:[#allocation8 + $0x128] ss:$16 sps:$4 sm:$0xff]  }
 0x114   :  { %1604 = vmatpush1.bf16.msra.mxu0 %v3935_v20  ;;  %1768 = vmatpush1.bf16.msra.mxu1 %v3938_v21  ;;  %v4034_v20 = vld [vmem:[#allocation8 + $0x144] ss:$16 sps:$4 sm:$0xff]   ;;  %v4037_v21 = vld [vmem:[#allocation8 + $0x14c] ss:$16 sps:$4 sm:$0xff]  }
 0x115   :  { %1605 = vmatprep.subr.bf16.mxu0 %v3943_v11  ;;  %1769 = vmatprep.subr.bf16.mxu1 %v3946_v23  ;;  %v4035_v11 = vld [vmem:[#allocation8 + $0x148] ss:$16 sps:$4 sm:$0xff]   ;;  %v4040_v23 = vld [vmem:[#allocation8 + $0x164] ss:$16 sps:$4 sm:$0xff]  }
 0x118   :  { %1606 = vmatpush1.bf16.msra.mxu0 %v3941_v24  ;;  %1770 = vmatpush1.bf16.msra.mxu1 %v3944_v25  ;;  %v4043_v24 = vld [vmem:[#allocation8 + $0x16c] ss:$16 sps:$4 sm:$0xff]   ;;  %v4038_v25 = vld [vmem:[#allocation8 + $0x160] ss:$16 sps:$4 sm:$0xff]  }
 0x119   :  { %1607 = vmatprep.subr.bf16.mxu0 %v3949_v26  ;;  %1771 = vmatprep.subr.bf16.mxu1 %v3952_v27  ;;  %v4041_v26 = vld [vmem:[#allocation8 + $0x168] ss:$16 sps:$4 sm:$0xff]   ;;  %v4046_v27 = vld [vmem:[#allocation8 + $0x184] ss:$16 sps:$4 sm:$0xff]  }
 0x11c   :  { %1608 = vmatpush1.bf16.msra.mxu0 %v3947_v28  ;;  %1772 = vmatpush1.bf16.msra.mxu1 %v3950_v29  ;;  %v4049_v28 = vld [vmem:[#allocation8 + $0x18c] ss:$16 sps:$4 sm:$0xff]   ;;  %v4044_v29 = vld [vmem:[#allocation8 + $0x180] ss:$16 sps:$4 sm:$0xff]  }
 0x11d   :  { %1609 = vmatprep.subr.bf16.mxu0 %v3955_v30  ;;  %1773 = vmatprep.subr.bf16.mxu1 %v3958_v31  ;;  %v4047_v30 = vld [vmem:[#allocation8 + $0x188] ss:$16 sps:$4 sm:$0xff]   ;;  %v4052_v31 = vld [vmem:[#allocation8 + $0x1a4] ss:$16 sps:$4 sm:$0xff]  }
 0x120   :  { %1610 = vmatpush1.bf16.msra.mxu0 %v3953_v32  ;;  %1774 = vmatpush1.bf16.msra.mxu1 %v3956_v33  ;;  %v4055_v32 = vld [vmem:[#allocation8 + $0x1ac] ss:$16 sps:$4 sm:$0xff]   ;;  %v4050_v33 = vld [vmem:[#allocation8 + $0x1a0] ss:$16 sps:$4 sm:$0xff]  }
 0x121   :  { %1611 = vmatprep.subr.bf16.mxu0 %v3961_v34  ;;  %1775 = vmatprep.subr.bf16.mxu1 %v3964_v35  ;;  %v4053_v34 = vld [vmem:[#allocation8 + $0x1a8] ss:$16 sps:$4 sm:$0xff]   ;;  %v4058_v35 = vld [vmem:[#allocation8 + $0x1c4] ss:$16 sps:$4 sm:$0xff]  }
 0x124   :  { %1612 = vmatpush1.bf16.msra.mxu0 %v3959_v36  ;;  %1776 = vmatpush1.bf16.msra.mxu1 %v3962_v37  ;;  %v4061_v36 = vld [vmem:[#allocation8 + $0x1cc] ss:$16 sps:$4 sm:$0xff]   ;;  %v4056_v37 = vld [vmem:[#allocation8 + $0x1c0] ss:$16 sps:$4 sm:$0xff]  }
 0x125   :  { %1613 = vmatprep.subr.bf16.mxu0 %v3967_v38  ;;  %1777 = vmatprep.subr.bf16.mxu1 %v3970_v39  ;;  %v4059_v38 = vld [vmem:[#allocation8 + $0x1c8] ss:$16 sps:$4 sm:$0xff]   ;;  %v4064_v39 = vld [vmem:[#allocation8 + $0x1e4] ss:$16 sps:$4 sm:$0xff]  }
 0x128   :  { %1614 = vmatpush1.bf16.msra.mxu0 %v3965_v40  ;;  %1778 = vmatpush1.bf16.msra.mxu1 %v3968_v41  ;;  %v4067_v40 = vld [vmem:[#allocation8 + $0x1ec] ss:$16 sps:$4 sm:$0xff]   ;;  %v4062_v41 = vld [vmem:[#allocation8 + $0x1e0] ss:$16 sps:$4 sm:$0xff]  }
 0x129   :  { %2610 = vmatprep.subr.bf16.mxu0 %v3974_v42  ;;  %2692 = vmatprep.subr.bf16.mxu1 %v3977_v43  ;;  %v4065_v42 = vld [vmem:[#allocation8 + $0x1e8] ss:$16 sps:$4 sm:$0xff]   ;;  %v4070_v43 = vld [vmem:[#allocation8 + $0x204] ss:$16 sps:$4 sm:$0xff]  }
 0x12b   :  { %1632 = vmatmul.mubr.bf16.vlgmr.msra.gmra.mrb[0].mxu0 %v3971_v44  ;;  %1796 = vmatmul.mubr.bf16.vlgmr.msra.gmra.mrb[0].mxu1 %v3971_v44  ;;  %v4073_v44 = vld [vmem:[#allocation8 + $0x20c] ss:$16 sps:$4 sm:$0xff]  }
 0x12c   :  { %2611 = vmatpush1.bf16.msra.mxu0 %v3972_v45  ;;  %2693 = vmatpush1.bf16.msra.mxu1 %v3975_v46  ;;  %v311_v45 = vlaneseq }
 0x12d   :  { %2612 = vmatprep.subr.bf16.mxu0 %v3980_v47  ;;  %2694 = vmatprep.subr.bf16.mxu1 %v3983_v48  ;;  %v4436_v48 = vld [vmem:[%s4484_s2] sm:$0xf] }
 0x12e   :  { %v4430_v46 = vshrl.u32 %v311_v45, 7  ;;  %v4130_v45 = vld [vmem:[#allocation8 + $0x344] ss:$16 sps:$4 sm:$0xff]  }
 0x130   :  { %2613 = vmatpush1.bf16.msra.mxu0 %v3978_v49  ;;  %2695 = vmatpush1.bf16.msra.mxu1 %v3981_v50  ;;  %v313_v47 = vsub.s32 0, %v4430_v46  ;;  %v317_v49 = vsub.s32 1, %v4430_v46  ;;  %v325_v50 = vsub.s32 3, %v4430_v46 }
 0x131   :  { %2614 = vmatprep.subr.bf16.mxu0 %v3986_v51  ;;  %2696 = vmatprep.subr.bf16.mxu1 %v3989_v52 }
 0x132   :  { %v314_v51 = vrot.slane %v4436_v48, %v313_v47  ;;  %v318_v52 = vrot.slane %v4436_v48, %v317_v49 }
 0x134   :  { %2615 = vmatpush1.bf16.msra.mxu0 %v3984_v53  ;;  %2697 = vmatpush1.bf16.msra.mxu1 %v3987_v54  ;;  %v326_v53 = vrot.slane %v4436_v48, %v325_v50 }
 0x135   :  { %2616 = vmatprep.subr.bf16.mxu0 %v3992_v55  ;;  %2698 = vmatprep.subr.bf16.mxu1 %v3995_v56 }
 0x138   :  { %2617 = vmatpush1.bf16.msra.mxu0 %v3990_v57  ;;  %2699 = vmatpush1.bf16.msra.mxu1 %v3993_v58 }
 0x139   :  { %2618 = vmatprep.subr.bf16.mxu0 %v3998_v59  ;;  %2700 = vmatprep.subr.bf16.mxu1 %v4001_v60 }
 0x13c   :  { %2619 = vmatpush1.bf16.msra.mxu0 %v3996_v61  ;;  %2701 = vmatpush1.bf16.msra.mxu1 %v3999_v62 }
 0x13d   :  { %2620 = vmatprep.subr.bf16.mxu0 %v4004_v63  ;;  %2702 = vmatprep.subr.bf16.mxu1 %v4007_v0 }
 0x140   :  { %2621 = vmatpush1.bf16.msra.mxu0 %v4002_v1  ;;  %2703 = vmatpush1.bf16.msra.mxu1 %v4005_v2 }
 0x141   :  { %2622 = vmatprep.subr.bf16.mxu0 %v4010_v3  ;;  %2704 = vmatprep.subr.bf16.mxu1 %v4013_v4 }
 0x144   :  { %2623 = vmatpush1.bf16.msra.mxu0 %v4008_v5  ;;  %2705 = vmatpush1.bf16.msra.mxu1 %v4011_v6  ;;  %v4068_v5 = vld [vmem:[#allocation8 + $0x200] ss:$16 sps:$4 sm:$0xff]   ;;  %v4071_v6 = vld [vmem:[#allocation8 + $0x208] ss:$16 sps:$4 sm:$0xff]  }
 0x145   :  { %2624 = vmatprep.subr.bf16.mxu0 %v4016_v7  ;;  %2706 = vmatprep.subr.bf16.mxu1 %v4019_v8  ;;  %v4076_v8 = vld [vmem:[#allocation8 + $0x224] ss:$16 sps:$4 sm:$0xff]  }
 0x148   :  { %2625 = vmatpush1.bf16.msra.mxu0 %v4014_v9  ;;  %2707 = vmatpush1.bf16.msra.mxu1 %v4017_v10  ;;  %v4079_v9 = vld [vmem:[#allocation8 + $0x22c] ss:$16 sps:$4 sm:$0xff]  }
 0x149   :  { %2626 = vmatprep.subr.bf16.mxu0 %v4022_v12  ;;  %2708 = vmatprep.subr.bf16.mxu1 %v4025_v13  ;;  %v4074_v12 = vld [vmem:[#allocation8 + $0x220] ss:$16 sps:$4 sm:$0xff]   ;;  %v4077_v13 = vld [vmem:[#allocation8 + $0x228] ss:$16 sps:$4 sm:$0xff]  }
 0x14c   :  { %2627 = vmatpush1.bf16.msra.mxu0 %v4020_v14  ;;  %2709 = vmatpush1.bf16.msra.mxu1 %v4023_v15  ;;  %v4082_v14 = vld [vmem:[#allocation8 + $0x244] ss:$16 sps:$4 sm:$0xff]   ;;  %v4085_v15 = vld [vmem:[#allocation8 + $0x24c] ss:$16 sps:$4 sm:$0xff]  }
 0x14d   :  { %2628 = vmatprep.subr.bf16.mxu0 %v4028_v16  ;;  %2710 = vmatprep.subr.bf16.mxu1 %v4031_v17  ;;  %v4080_v16 = vld [vmem:[#allocation8 + $0x240] ss:$16 sps:$4 sm:$0xff]   ;;  %v4083_v17 = vld [vmem:[#allocation8 + $0x248] ss:$16 sps:$4 sm:$0xff]  }
 0x150   :  { %2629 = vmatpush1.bf16.msra.mxu0 %v4026_v18  ;;  %2711 = vmatpush1.bf16.msra.mxu1 %v4029_v19  ;;  %v4088_v18 = vld [vmem:[#allocation8 + $0x264] ss:$16 sps:$4 sm:$0xff]   ;;  %v4091_v19 = vld [vmem:[#allocation8 + $0x26c] ss:$16 sps:$4 sm:$0xff]  }
 0x151   :  { %2630 = vmatprep.subr.bf16.mxu0 %v4034_v20  ;;  %2712 = vmatprep.subr.bf16.mxu1 %v4037_v21  ;;  %v4086_v20 = vld [vmem:[#allocation8 + $0x260] ss:$16 sps:$4 sm:$0xff]   ;;  %v4089_v21 = vld [vmem:[#allocation8 + $0x268] ss:$16 sps:$4 sm:$0xff]  }
 0x154   :  { %2631 = vmatpush1.bf16.msra.mxu0 %v4032_v22  ;;  %2713 = vmatpush1.bf16.msra.mxu1 %v4035_v11  ;;  %v4094_v22 = vld [vmem:[#allocation8 + $0x284] ss:$16 sps:$4 sm:$0xff]   ;;  %v4097_v11 = vld [vmem:[#allocation8 + $0x28c] ss:$16 sps:$4 sm:$0xff]  }
 0x155   :  { %2632 = vmatprep.subr.bf16.mxu0 %v4040_v23  ;;  %2714 = vmatprep.subr.bf16.mxu1 %v4043_v24  ;;  %v4092_v23 = vld [vmem:[#allocation8 + $0x280] ss:$16 sps:$4 sm:$0xff]   ;;  %v4095_v24 = vld [vmem:[#allocation8 + $0x288] ss:$16 sps:$4 sm:$0xff]  }
 0x158   :  { %2633 = vmatpush1.bf16.msra.mxu0 %v4038_v25  ;;  %2715 = vmatpush1.bf16.msra.mxu1 %v4041_v26  ;;  %v4100_v25 = vld [vmem:[#allocation8 + $0x2a4] ss:$16 sps:$4 sm:$0xff]   ;;  %v4103_v26 = vld [vmem:[#allocation8 + $0x2ac] ss:$16 sps:$4 sm:$0xff]  }
 0x159   :  { %2634 = vmatprep.subr.bf16.mxu0 %v4046_v27  ;;  %2716 = vmatprep.subr.bf16.mxu1 %v4049_v28  ;;  %v4098_v27 = vld [vmem:[#allocation8 + $0x2a0] ss:$16 sps:$4 sm:$0xff]   ;;  %v4101_v28 = vld [vmem:[#allocation8 + $0x2a8] ss:$16 sps:$4 sm:$0xff]  }
 0x15c   :  { %2635 = vmatpush1.bf16.msra.mxu0 %v4044_v29  ;;  %2717 = vmatpush1.bf16.msra.mxu1 %v4047_v30  ;;  %v4106_v29 = vld [vmem:[#allocation8 + $0x2c4] ss:$16 sps:$4 sm:$0xff]   ;;  %v4109_v30 = vld [vmem:[#allocation8 + $0x2cc] ss:$16 sps:$4 sm:$0xff]  }
 0x15d   :  { %2636 = vmatprep.subr.bf16.mxu0 %v4052_v31  ;;  %2718 = vmatprep.subr.bf16.mxu1 %v4055_v32  ;;  %v4104_v31 = vld [vmem:[#allocation8 + $0x2c0] ss:$16 sps:$4 sm:$0xff]   ;;  %v4107_v32 = vld [vmem:[#allocation8 + $0x2c8] ss:$16 sps:$4 sm:$0xff]  }
 0x160   :  { %2637 = vmatpush1.bf16.msra.mxu0 %v4050_v33  ;;  %2719 = vmatpush1.bf16.msra.mxu1 %v4053_v34  ;;  %v4112_v33 = vld [vmem:[#allocation8 + $0x2e4] ss:$16 sps:$4 sm:$0xff]   ;;  %v4115_v34 = vld [vmem:[#allocation8 + $0x2ec] ss:$16 sps:$4 sm:$0xff]  }
 0x161   :  { %2638 = vmatprep.subr.bf16.mxu0 %v4058_v35  ;;  %2720 = vmatprep.subr.bf16.mxu1 %v4061_v36  ;;  %v4110_v35 = vld [vmem:[#allocation8 + $0x2e0] ss:$16 sps:$4 sm:$0xff]   ;;  %v4113_v36 = vld [vmem:[#allocation8 + $0x2e8] ss:$16 sps:$4 sm:$0xff]  }
 0x164   :  { %2639 = vmatpush1.bf16.msra.mxu0 %v4056_v37  ;;  %2721 = vmatpush1.bf16.msra.mxu1 %v4059_v38  ;;  %v4118_v37 = vld [vmem:[#allocation8 + $0x304] ss:$16 sps:$4 sm:$0xff]   ;;  %v4121_v38 = vld [vmem:[#allocation8 + $0x30c] ss:$16 sps:$4 sm:$0xff]  }
 0x165   :  { %2640 = vmatprep.subr.bf16.mxu0 %v4064_v39  ;;  %2722 = vmatprep.subr.bf16.mxu1 %v4067_v40  ;;  %v4116_v39 = vld [vmem:[#allocation8 + $0x300] ss:$16 sps:$4 sm:$0xff]   ;;  %v4119_v40 = vld [vmem:[#allocation8 + $0x308] ss:$16 sps:$4 sm:$0xff]  }
 0x168   :  { %2641 = vmatpush1.bf16.msra.mxu0 %v4062_v41  ;;  %2723 = vmatpush1.bf16.msra.mxu1 %v4065_v42  ;;  %v4124_v41 = vld [vmem:[#allocation8 + $0x324] ss:$16 sps:$4 sm:$0xff]   ;;  %v4127_v42 = vld [vmem:[#allocation8 + $0x32c] ss:$16 sps:$4 sm:$0xff]  }
 0x169   :  { %2651 = vmatprep.subr.bf16.mxu0 %v4070_v43  ;;  %2733 = vmatprep.subr.bf16.mxu1 %v4073_v44  ;;  %v4122_v43 = vld [vmem:[#allocation8 + $0x320] ss:$16 sps:$4 sm:$0xff]   ;;  %v4125_v44 = vld [vmem:[#allocation8 + $0x328] ss:$16 sps:$4 sm:$0xff]  }
 0x1fe   :  { %v1633_v54 = vpop.f32.mrb[0].mxu0  ;;  %v4449_v55 = vpop.f32.mrb[0].mxu1 }
 0x1ff   :  { %v3579_v56 = vadd.f32 %v1633_v54, %v314_v51  ;;  %v1635_v57 = vpop.f32.mrb[1].mxu0  ;;  %v1799_v58 = vpop.f32.mrb[1].mxu1  ;;  %v4133_v51 = vld [vmem:[#allocation8 + $0x34c] ss:$16 sps:$4 sm:$0xff]   ;;  %v4136_v54 = vld [vmem:[#allocation8 + $0x364] ss:$16 sps:$4 sm:$0xff]  }
 0x200   :  { %v3580_v59 = vadd.f32 %v1635_v57, %v318_v52  ;;  %v3582_v60 = vadd.f32 %v1799_v58, %v326_v53  ;;  %v1637_v61 = vpop.f32.mrb[2].mxu0  ;;  %v1801_v62 = vpop.f32.mrb[2].mxu1  ;;  %v4128_v52 = vld [vmem:[#allocation8 + $0x340] ss:$16 sps:$4 sm:$0xff]   ;;  %v4131_v53 = vld [vmem:[#allocation8 + $0x348] ss:$16 sps:$4 sm:$0xff]  }
 0x201   :  { %v1804_v63 = vmax.f32 %v3579_v56, 0.0  ;;  %v1638_v0 = vpop.f32.mrb[3].mxu0  ;;  %v1802_v1 = vpop.f32.mrb[3].mxu1  ;;  %v4139_v56 = vld [vmem:[#allocation8 + $0x36c] ss:$16 sps:$4 sm:$0xff]  }
 0x202   :  { %v1805_v2 = vmax.f32 %v3580_v59, 0.0  ;;  %v1807_v3 = vmax.f32 %v3582_v60, 0.0  ;;  %v4134_v57 = vld [vmem:[#allocation8 + $0x360] ss:$16 sps:$4 sm:$0xff]   ;;  %v4137_v58 = vld [vmem:[#allocation8 + $0x368] ss:$16 sps:$4 sm:$0xff]  }
 0x203   :  { %v1816_v7 = vpack.c.bf16 %v1804_v63, %v1804_v63  ;;  %v4142_v59 = vld [vmem:[#allocation8 + $0x384] ss:$16 sps:$4 sm:$0xff]   ;;  %v4145_v60 = vld [vmem:[#allocation8 + $0x38c] ss:$16 sps:$4 sm:$0xff]   ;;  %v4140_v61 = vld [vmem:[#allocation8 + $0x380] ss:$16 sps:$4 sm:$0xff]  }
 0x204   :  { %v1817_v4 = vpack.c.bf16 %v1805_v2, %v1805_v2  ;;  %v1819_v10 = vpack.c.bf16 %v1807_v3, %v1807_v3  ;;  %v4143_v62 = vld [vmem:[#allocation8 + $0x388] ss:$16 sps:$4 sm:$0xff]   ;;  %v321_v63 = vsub.s32 2, %v4430_v46  ;;  %v4148_v0 = vld [vmem:[#allocation8 + $0x3a4] ss:$16 sps:$4 sm:$0xff]  }
 0x205   :  { %v4151_v1 = vld [vmem:[#allocation8 + $0x3ac] ss:$16 sps:$4 sm:$0xff]   ;;  %v4146_v2 = vld [vmem:[#allocation8 + $0x3a0] ss:$16 sps:$4 sm:$0xff]   ;;  %v4149_v3 = vld [vmem:[#allocation8 + $0x3a8] ss:$16 sps:$4 sm:$0xff]  }
 0x206   :  { %2642 = vmatprep.mubr.bf16.mxu0 %v1817_v4  ;;  %2724 = vmatprep.mubr.bf16.mxu1 %v1817_v4  ;;  %v322_v4 = vrot.slane %v4436_v48, %v321_v63  ;;  %v4164_v48 = vld [vmem:[#allocation9 + $0x40] sm:$0xff]  }
 0x207   :  { %2643 = vmatmul.mubr.bf16.vlgmr.msra.gmra.mrb[4].mxu0 %v1816_v7  ;;  %2725 = vmatmul.mubr.bf16.vlgmr.msra.gmra.mrb[4].mxu1 %v1816_v7  ;;  %v4152_v7 = vld [vmem:[#allocation8 + $0x3c0] ss:$16 sps:$4 sm:$0xff]  }
 0x208   :  { %2652 = vmatpush1.bf16.msra.mxu0 %v4068_v5  ;;  %2734 = vmatpush1.bf16.msra.mxu1 %v4071_v6  ;;  %v4154_v5 = vld [vmem:[#allocation8 + $0x3c4] ss:$16 sps:$4 sm:$0xff]   ;;  %v4157_v6 = vld [vmem:[#allocation8 + $0x3cc] ss:$16 sps:$4 sm:$0xff]  }
 0x209   :  { %2683 = vmatprep.mubr.bf16.mxu0 %v1819_v10  ;;  %2765 = vmatprep.mubr.bf16.mxu1 %v1819_v10  ;;  %v4160_v10 = vld [vmem:[#allocation8 + $0x3e4] ss:$16 sps:$4 sm:$0xff]  }
 0x20a   :  { %2653 = vmatprep.subr.bf16.mxu0 %v4076_v8  ;;  %2735 = vmatprep.subr.bf16.mxu1 %v4079_v9  ;;  %v4155_v8 = vld [vmem:[#allocation8 + $0x3c8] ss:$16 sps:$4 sm:$0xff]   ;;  %v3581_v9 = vadd.f32 %v4449_v55, %v322_v4 }
 0x20b   :  { %v4168_v55 = vld [vmem:[#allocation9 + $0x48] sm:$0xff]  }
 0x20c   :  { %2654 = vmatpush1.bf16.msra.mxu0 %v4074_v12  ;;  %2736 = vmatpush1.bf16.msra.mxu1 %v4077_v13  ;;  %v4163_v12 = vld [vmem:[#allocation8 + $0x3ec] ss:$16 sps:$4 sm:$0xff]   ;;  %v4158_v13 = vld [vmem:[#allocation8 + $0x3e0] ss:$16 sps:$4 sm:$0xff]  }
 0x20d   :  { %2655 = vmatprep.subr.bf16.mxu0 %v4082_v14  ;;  %2737 = vmatprep.subr.bf16.mxu1 %v4085_v15  ;;  %v4161_v14 = vld [vmem:[#allocation8 + $0x3e8] ss:$16 sps:$4 sm:$0xff]   ;;  %v1806_v15 = vmax.f32 %v3581_v9, 0.0 }
 0x210   :  { %2656 = vmatpush1.bf16.msra.mxu0 %v4080_v16  ;;  %2738 = vmatpush1.bf16.msra.mxu1 %v4083_v17  ;;  %v4165_v16 = vld [vmem:[#allocation9 + $0xc0] sm:$0xff]  }
 0x211   :  { %2657 = vmatprep.subr.bf16.mxu0 %v4088_v18  ;;  %2739 = vmatprep.subr.bf16.mxu1 %v4091_v19  ;;  %v4166_v17 = vld [vmem:[#allocation9] sm:$0xff]   ;;  %v1818_v19 = vpack.c.bf16 %v1806_v15, %v1806_v15 }
 0x212   :  { %v4167_v18 = vld [vmem:[#allocation9 + $0x80] sm:$0xff]  }
 0x214   :  { %2658 = vmatpush1.bf16.msra.mxu0 %v4086_v20  ;;  %2740 = vmatpush1.bf16.msra.mxu1 %v4089_v21  ;;  %v4169_v20 = vld [vmem:[#allocation9 + $0xc8] sm:$0xff]  }
 0x215   :  { %2659 = vmatprep.subr.bf16.mxu0 %v4094_v22  ;;  %2741 = vmatprep.subr.bf16.mxu1 %v4097_v11  ;;  %v4170_v21 = vld [vmem:[#allocation9 + $0x8] sm:$0xff]   ;;  %v4172_v11 = vld [vmem:[#allocation9 + $0x50] sm:$0xff]  }
 0x216   :  { %v4171_v22 = vld [vmem:[#allocation9 + $0x88] sm:$0xff]  }
 0x218   :  { %2660 = vmatpush1.bf16.msra.mxu0 %v4092_v23  ;;  %2742 = vmatpush1.bf16.msra.mxu1 %v4095_v24  ;;  %v4173_v23 = vld [vmem:[#allocation9 + $0xd0] sm:$0xff]  }
 0x219   :  { %2661 = vmatprep.subr.bf16.mxu0 %v4100_v25  ;;  %2743 = vmatprep.subr.bf16.mxu1 %v4103_v26  ;;  %v4174_v24 = vld [vmem:[#allocation9 + $0x10] sm:$0xff]   ;;  %v4176_v26 = vld [vmem:[#allocation9 + $0x58] sm:$0xff]  }
 0x21a   :  { %v4175_v25 = vld [vmem:[#allocation9 + $0x90] sm:$0xff]  }
 0x21c   :  { %2662 = vmatpush1.bf16.msra.mxu0 %v4098_v27  ;;  %2744 = vmatpush1.bf16.msra.mxu1 %v4101_v28  ;;  %v4177_v27 = vld [vmem:[#allocation9 + $0xd8] sm:$0xff]  }
 0x21d   :  { %2663 = vmatprep.subr.bf16.mxu0 %v4106_v29  ;;  %2745 = vmatprep.subr.bf16.mxu1 %v4109_v30  ;;  %v4178_v28 = vld [vmem:[#allocation9 + $0x18] sm:$0xff]   ;;  %v4180_v30 = vld [vmem:[#allocation9 + $0x60] sm:$0xff]  }
 0x21e   :  { %v4179_v29 = vld [vmem:[#allocation9 + $0x98] sm:$0xff]  }
 0x220   :  { %2664 = vmatpush1.bf16.msra.mxu0 %v4104_v31  ;;  %2746 = vmatpush1.bf16.msra.mxu1 %v4107_v32  ;;  %v4181_v31 = vld [vmem:[#allocation9 + $0xe0] sm:$0xff]  }
 0x221   :  { %2665 = vmatprep.subr.bf16.mxu0 %v4112_v33  ;;  %2747 = vmatprep.subr.bf16.mxu1 %v4115_v34  ;;  %v4182_v32 = vld [vmem:[#allocation9 + $0x20] sm:$0xff]   ;;  %v4184_v34 = vld [vmem:[#allocation9 + $0x68] sm:$0xff]  }
 0x222   :  { %v4183_v33 = vld [vmem:[#allocation9 + $0xa0] sm:$0xff]  }
 0x224   :  { %2666 = vmatpush1.bf16.msra.mxu0 %v4110_v35  ;;  %2748 = vmatpush1.bf16.msra.mxu1 %v4113_v36  ;;  %v4185_v35 = vld [vmem:[#allocation9 + $0xe8] sm:$0xff]  }
 0x225   :  { %2667 = vmatprep.subr.bf16.mxu0 %v4118_v37  ;;  %2749 = vmatprep.subr.bf16.mxu1 %v4121_v38  ;;  %v4186_v36 = vld [vmem:[#allocation9 + $0x28] sm:$0xff]   ;;  %v4188_v38 = vld [vmem:[#allocation9 + $0x70] sm:$0xff]  }
 0x226   :  { %v4187_v37 = vld [vmem:[#allocation9 + $0xa8] sm:$0xff]  }
 0x228   :  { %2668 = vmatpush1.bf16.msra.mxu0 %v4116_v39  ;;  %2750 = vmatpush1.bf16.msra.mxu1 %v4119_v40  ;;  %v4189_v39 = vld [vmem:[#allocation9 + $0xf0] sm:$0xff]  }
 0x229   :  { %2669 = vmatprep.subr.bf16.mxu0 %v4124_v41  ;;  %2751 = vmatprep.subr.bf16.mxu1 %v4127_v42  ;;  %v4190_v40 = vld [vmem:[#allocation9 + $0x30] sm:$0xff]   ;;  %v4192_v42 = vld [vmem:[#allocation9 + $0x78] sm:$0xff]  }
 0x22a   :  { %v4191_v41 = vld [vmem:[#allocation9 + $0xb0] sm:$0xff]  }
 0x22c   :  { %2670 = vmatpush1.bf16.msra.mxu0 %v4122_v43  ;;  %2752 = vmatpush1.bf16.msra.mxu1 %v4125_v44  ;;  %v4193_v43 = vld [vmem:[#allocation9 + $0xf8] sm:$0xff]  }
 0x22d   :  { %2671 = vmatprep.subr.bf16.mxu0 %v4130_v45  ;;  %2753 = vmatprep.subr.bf16.mxu1 %v4133_v51  ;;  %v4194_v44 = vld [vmem:[#allocation9 + $0x38] sm:$0xff]   ;;  %v1948_v51 = vld [vmem:[%s4486_s4] sm:$0xf] }
 0x22e   :  { %v4195_v45 = vld [vmem:[#allocation9 + $0xb8] sm:$0xff]  }
 0x230   :  { %2672 = vmatpush1.bf16.msra.mxu0 %v4128_v52  ;;  %2754 = vmatpush1.bf16.msra.mxu1 %v4131_v53  ;;  %v1953_v52 = vrot.slane %v1948_v51, %v313_v47  ;;  %v1961_v53 = vrot.slane %v1948_v51, %v321_v63 }
 0x231   :  { %2673 = vmatprep.subr.bf16.mxu0 %v4136_v54  ;;  %2755 = vmatprep.subr.bf16.mxu1 %v4139_v56  ;;  %v1957_v54 = vrot.slane %v1948_v51, %v317_v49  ;;  %v1965_v56 = vrot.slane %v1948_v51, %v325_v50 }
 0x234   :  { %2674 = vmatpush1.bf16.msra.mxu0 %v4134_v57  ;;  %2756 = vmatpush1.bf16.msra.mxu1 %v4137_v58 }
 0x235   :  { %2675 = vmatprep.subr.bf16.mxu0 %v4142_v59  ;;  %2757 = vmatprep.subr.bf16.mxu1 %v4145_v60 }
 0x238   :  { %2676 = vmatpush1.bf16.msra.mxu0 %v4140_v61  ;;  %2758 = vmatpush1.bf16.msra.mxu1 %v4143_v62 }
 0x239   :  { %2677 = vmatprep.subr.bf16.mxu0 %v4148_v0  ;;  %2759 = vmatprep.subr.bf16.mxu1 %v4151_v1 }
 0x23c   :  { %2678 = vmatpush1.bf16.msra.mxu0 %v4146_v2  ;;  %2760 = vmatpush1.bf16.msra.mxu1 %v4149_v3 }
 0x23d   :  { %2679 = vmatprep.subr.bf16.mxu0 %v4154_v5  ;;  %2761 = vmatprep.subr.bf16.mxu1 %v4157_v6 }
 0x240   :  { %2680 = vmatpush1.bf16.msra.mxu0 %v4152_v7  ;;  %2762 = vmatpush1.bf16.msra.mxu1 %v4155_v8 }
 0x241   :  { %2681 = vmatprep.subr.bf16.mxu0 %v4160_v10  ;;  %2763 = vmatprep.subr.bf16.mxu1 %v4163_v12  ;;  %v3502_v12 = vld [vmem:[%s4488_s6] ss:$0 sm:$0xff] }
 0x244   :  { %2682 = vmatpush1.bf16.msra.mxu0 %v4158_v13  ;;  %2764 = vmatpush1.bf16.msra.mxu1 %v4161_v14 }
 0x245   :  { %3535 = vmatprep.subr.bf16.mxu0 %v4164_v48  ;;  %3557 = vmatprep.subr.bf16.mxu1 %v4165_v16 }
 0x247   :  { %2684 = vmatmul.mubr.bf16.vlgmr.msra.gmra.mrb[4].mxu0 %v1818_v19  ;;  %2766 = vmatmul.mubr.bf16.vlgmr.msra.gmra.mrb[4].mxu1 %v1818_v19 }
 0x248   :  { %3536 = vmatpush3.bf16.msra.mxu0 %v4166_v17  ;;  %3558 = vmatpush3.bf16.msra.mxu1 %v4167_v18 }
 0x249   :  { %3537 = vmatprep.subr.bf16.mxu0 %v4168_v55  ;;  %3559 = vmatprep.subr.bf16.mxu1 %v4169_v20 }
 0x24c   :  { %3538 = vmatpush3.bf16.msra.mxu0 %v4170_v21  ;;  %3560 = vmatpush3.bf16.msra.mxu1 %v4171_v22 }
 0x24d   :  { %3539 = vmatprep.subr.bf16.mxu0 %v4172_v11  ;;  %3561 = vmatprep.subr.bf16.mxu1 %v4173_v23 }
 0x250   :  { %3540 = vmatpush3.bf16.msra.mxu0 %v4174_v24  ;;  %3562 = vmatpush3.bf16.msra.mxu1 %v4175_v25 }
 0x251   :  { %3541 = vmatprep.subr.bf16.mxu0 %v4176_v26  ;;  %3563 = vmatprep.subr.bf16.mxu1 %v4177_v27 }
 0x254   :  { %3542 = vmatpush3.bf16.msra.mxu0 %v4178_v28  ;;  %3564 = vmatpush3.bf16.msra.mxu1 %v4179_v29 }
 0x255   :  { %3543 = vmatprep.subr.bf16.mxu0 %v4180_v30  ;;  %3565 = vmatprep.subr.bf16.mxu1 %v4181_v31 }
 0x258   :  { %3544 = vmatpush3.bf16.msra.mxu0 %v4182_v32  ;;  %3566 = vmatpush3.bf16.msra.mxu1 %v4183_v33 }
 0x259   :  { %3545 = vmatprep.subr.bf16.mxu0 %v4184_v34  ;;  %3567 = vmatprep.subr.bf16.mxu1 %v4185_v35 }
 0x25c   :  { %3546 = vmatpush3.bf16.msra.mxu0 %v4186_v36  ;;  %3568 = vmatpush3.bf16.msra.mxu1 %v4187_v37 }
 0x25d   :  { %3547 = vmatprep.subr.bf16.mxu0 %v4188_v38  ;;  %3569 = vmatprep.subr.bf16.mxu1 %v4189_v39 }
 0x260   :  { %3548 = vmatpush3.bf16.msra.mxu0 %v4190_v40  ;;  %3570 = vmatpush3.bf16.msra.mxu1 %v4191_v41 }
 0x261   :  { %3549 = vmatprep.subr.bf16.mxu0 %v4192_v42  ;;  %3571 = vmatprep.subr.bf16.mxu1 %v4193_v43 }
 0x264   :  { %3550 = vmatpush3.bf16.msra.mxu0 %v4194_v44  ;;  %3572 = vmatpush3.bf16.msra.mxu1 %v4195_v45 }
 0x31a   :  { %v2685_v57 = vpop.f32.mrb[4].mxu0  ;;  %v2767_v58 = vpop.f32.mrb[4].mxu1 }
 0x31b   :  { %v3583_v59 = vadd.f32 %v2685_v57, %v1953_v52  ;;  %v3585_v60 = vadd.f32 %v2767_v58, %v1961_v53  ;;  %v2687_v61 = vpop.f32.mrb[5].mxu0  ;;  %v2769_v62 = vpop.f32.mrb[5].mxu1 }
 0x31c   :  { %v3584_v0 = vadd.f32 %v2687_v61, %v1957_v54  ;;  %v3586_v1 = vadd.f32 %v2769_v62, %v1965_v56  ;;  %v2689_v2 = vpop.f32.mrb[6].mxu0  ;;  %v2771_v3 = vpop.f32.mrb[6].mxu1 }
 0x31d   :  { %v2774_v47 = vmax.f32 %v3583_v59, 0.0  ;;  %v2776_v4 = vmax.f32 %v3585_v60, 0.0  ;;  %v2690_v5 = vpop.f32.mrb[7].mxu0  ;;  %v2772_v63 = vpop.f32.mrb[7].mxu1 }
 0x31e   :  { %v2775_v6 = vmax.f32 %v3584_v0, 0.0  ;;  %v2777_v7 = vmax.f32 %v3586_v1, 0.0 }
 0x31f   :  { %v2778_v46 = vpack.c.bf16 %v2774_v47, %v2774_v47  ;;  %v2780_v50 = vpack.c.bf16 %v2776_v4, %v2776_v4 }
 0x320   :  { %v2779_v49 = vpack.c.bf16 %v2775_v6, %v2775_v6  ;;  %v2781_v8 = vpack.c.bf16 %v2777_v7, %v2777_v7 }
 0x322   :  { %3077 = vmatprep.mubr.bf16.mxu0 %v2779_v49  ;;  %3117 = vmatprep.mubr.bf16.mxu1 %v2781_v8 }
 0x323   :  { %3078 = vmatmul.mubr.bf16.vlgmr.msra.gmra.mrb[8].mxu0 %v2778_v46  ;;  %3118 = vmatmul.mubr.bf16.vlgmr.msra.gmra.mrb[8].mxu1 %v2780_v50 }
 0x3f6   :  { %v3551_v9 = vpop.f32.mrb[8].mxu0  ;;  %v3573_v10 = vpop.f32.mrb[8].mxu1 }
 0x3f7   :  { %v3552_v13 = vpop.f32.mrb[9].mxu0  ;;  %v3574_v14 = vpop.f32.mrb[9].mxu1 }
 0x3f8   :  { %v3553_v15 = vadd.f32 %v3552_v13, %v3551_v9  ;;  %v3575_v48 = vadd.f32 %v3574_v14, %v3573_v10  ;;  %v3554_v16 = vpop.f32.mrb[10].mxu0  ;;  %v3576_v17 = vpop.f32.mrb[10].mxu1 }
 0x3f9   :  { %v3555_v18 = vpop.f32.mrb[11].mxu0  ;;  %v3577_v19 = vpop.f32.mrb[11].mxu1 }
 0x3fa   :  { %v3080_v55 = vadd.f32 %v3553_v15, %v3502_v12 }
 0x3fc   :  { %v3120_v20 = vadd.f32 %v3575_v48, %v3080_v55 }
 0x3fe   :  { %3125 = vst [vmem:[#allocation11] sm:$0xff] %v3120_v20 }
 0x3ff   :  { %4295 = shalt.err (!%p4292_p8)
}
 0x400   :  { %s4296_s10 = scalar_lea.hbm %s4489_s7, 128 }
 0x401   :  { %p4297_p9 = scmp.ne.s32.totalorder %s4489_s7, %s4296_s10  ;;  %p4300_p10 = scmp.lt.u32.totalorder %s4296_s10, %s4489_s7 }
 0x403   :  { %p4302_p11 = pnand %p4300_p10, %p4297_p9 }
 0x405   :  { %4305 = shalt.err (!%p4302_p11)
}
 0x406   :  { %3135 = dma.vmem_to_hbm [thread:$0]  %s3133_s30, 128, %s4489_s7, [#allocation5]  }
 0x407   :  { %4312 = dma.done.wait [#allocation5], 128  }
 0x408   :  { %4313 = vsyncadd [#allocation5], 4294967168 }
 0x409   :  { %3139 = vsyncpa [#allocation4], 1 }
 0x40a   :  { %3140 = vsyncpa [#allocation7], 1 }
 0x40b   :  { %3141 = vsyncpa [#allocation10], 1 }
 0x40c   :  { %3142 = vsyncpa [#allocation5], 1 }

</bundles_post_ra>
